<compile_context>
chip_gen: v5e
topology: v5e:2x2
jax: 0.10.0
libtpu: 0.0.40
codegen_flags: <defaults>
</compile_context>

<pallas_src>
import functools

import jax
import jax.numpy as jnp
from jax.experimental import pallas as pl
from jax.experimental.pallas import tpu as pltpu


def _cdiv(a, b):
    return -(-a // b)


def _spatial_attention_kernel(x_ref, w_ref, o_ref, pad_a, pad_m, *, C, H, W, K):
    # x_ref : (Bt, C, H*W)   VMEM block, native dtype
    # w_ref : (2*K*K + 1,)   SMEM   -- conv weights [c, ky, kx] flattened, then bias
    # o_ref : (Bt, C, H*W)   VMEM output block
    # pad_a, pad_m : (Bt, H*W + 2*PAD0) f32 VMEM scratch (zero-padded flat planes)
    P = K // 2
    HW = H * W
    PAD0 = P * W + P
    Lpad = HW + 2 * PAD0
    BT = x_ref.shape[0]

    # ---- channel pooling, accumulated in f32 (no f32 copy of the block) ----
    xv = x_ref[...]                                             # (Bt, C, HW) native
    avg = jnp.sum(xv, axis=1, dtype=jnp.float32) * (1.0 / C)    # (Bt, HW) f32
    mx = jnp.max(xv, axis=1).astype(jnp.float32)                # (Bt, HW) f32

    # ---- zero-padded flattened planes (zero only the halo strips) ----
    zero_halo = jnp.zeros((BT, PAD0), jnp.float32)
    pad_a[:, 0:PAD0] = zero_halo
    pad_a[:, PAD0 + HW:Lpad] = zero_halo
    pad_m[:, 0:PAD0] = zero_halo
    pad_m[:, PAD0 + HW:Lpad] = zero_halo
    pad_a[:, PAD0:PAD0 + HW] = avg                              # plane 0 = avg
    pad_m[:, PAD0:PAD0 + HW] = mx                               # plane 1 = max

    # Column index per lane (hoisted once; masks are built per-ox from it).
    col = jax.lax.broadcasted_iota(jnp.int32, (BT, HW), 1) % W

    # ---- 7x7 conv over the 2-plane pooled map, grouped by horizontal offset ----
    # Per (ky,kx) tap: 2 shifted (Bt,HW) reads + 2 FMAs. The column-validity
    # mask depends only on ox, so it is applied once per ox on the partial sum
    # (7 selects total instead of 98 mask multiplies). p0/p1 per ox keep the
    # accumulation chains short and independent.
    acc = jnp.zeros((BT, HW), jnp.float32)
    for kx in range(K):
        ox = kx - P
        p0 = jnp.zeros((BT, HW), jnp.float32)
        p1 = jnp.zeros((BT, HW), jnp.float32)
        for ky in range(K):
            start = PAD0 + (ky - P) * W + ox                    # static offset
            p0 = p0 + pad_a[:, start:start + HW] * w_ref[ky * K + kx]
            p1 = p1 + pad_m[:, start:start + HW] * w_ref[K * K + ky * K + kx]
        part = p0 + p1
        if ox != 0:
            valid = (col >= -ox) if ox < 0 else (col < (W - ox))
            part = jnp.where(valid, part, 0.0)
        acc = acc + part

    scale = jax.nn.sigmoid(acc + w_ref[2 * K * K])              # (Bt, HW), EUP

    # ---- apply: out = x * scale (broadcast over C); native-dtype HBM path ----
    o_ref[...] = (x_ref[...] * scale[:, None, :].astype(o_ref.dtype)
                  ).astype(o_ref.dtype)


def spatial_attention(x_nchw, conv_w, conv_b, *, alias_input_to_output=False):
    """x_nchw: (B, C, H, W). conv_w: (1, 2, K, K) (PyTorch OIHW), conv_b: (1,)."""
    B, C, H, W = x_nchw.shape
    K = conv_w.shape[-1]
    assert conv_w.shape == (1, 2, K, K) and K % 2 == 1
    P = K // 2
    HW = H * W
    PAD0 = P * W + P
    Lpad = HW + 2 * PAD0

    x3 = x_nchw.reshape(B, C, HW)
    # Flattened conv weights [c, ky, kx] + bias at the end; lives in SMEM.
    w_all = jnp.concatenate(
        [conv_w.reshape(-1), conv_b.reshape(-1)]).astype(jnp.float32)

    # ---- generation-aware VMEM budget (128 MiB on v5e/v6e, 64 MiB on v7x) ----
    try:
        vmem_cap = int(pltpu.get_tpu_info().vmem_capacity_bytes)
    except Exception:
        vmem_cap = 64 * 2 ** 20                 # conservative (v7x) fallback
    vmem_budget = (vmem_cap * 3) // 4

    itemsize = jnp.dtype(x_nchw.dtype).itemsize
    slab = C * HW * itemsize                    # bytes of x per batch element

    def _need(btv):
        # double-buffered in + out blocks, two padded f32 planes, f32 conv
        # temporaries / scale, plus slack.
        return (4 * btv * slab + 2 * btv * Lpad * 4
                + btv * C * HW * 4 + 16 * btv * HW * 4 + (2 << 20))

    # Multi-batch blocking: target ~4 MiB input blocks, fit the VMEM budget,
    # keep Bt a divisor of B.
    target = 4 << 20
    bt = max(1, min(B, target // max(slab, 1)))
    while bt > 1 and _need(bt) > vmem_budget:
        bt -= 1
    while bt > 1 and B % bt != 0:
        bt -= 1
    # v7x megacore: keep >= 2 parallel grid steps when there is enough data.
    if B > 1 and bt == B and (B // 2) * slab >= (1 << 20):
        bt = B // 2
        while bt > 1 and B % bt != 0:
            bt -= 1
    grid_b = _cdiv(B, bt)

    vmem_limit = int(min(vmem_cap, max(vmem_budget, _need(bt))))

    kernel = functools.partial(_spatial_attention_kernel, C=C, H=H, W=W, K=K)

    out = pl.pallas_call(
        kernel,
        out_shape=jax.ShapeDtypeStruct((B, C, HW), x_nchw.dtype),
        grid=(grid_b,),
        in_specs=[
            pl.BlockSpec((bt, C, HW), lambda b: (b, 0, 0)),         # x, Bt batches
            pl.BlockSpec(memory_space=pltpu.MemorySpace.SMEM),      # conv params
        ],
        out_specs=pl.BlockSpec((bt, C, HW), lambda b: (b, 0, 0)),
        scratch_shapes=[pltpu.VMEM((bt, Lpad), jnp.float32),        # avg plane
                        pltpu.VMEM((bt, Lpad), jnp.float32)],       # max plane
        compiler_params=pltpu.CompilerParams(
            dimension_semantics=("parallel",),
            vmem_limit_bytes=vmem_limit),
        # Optional: alias x to the output (blocks are fully read before
        # writeback and the index maps are identical, so this is safe) -- only
        # enable when x is dead after this op.
        input_output_aliases=({0: 0} if alias_input_to_output else {}),
    )(x3, w_all)

    return out.reshape(B, C, H, W)


def _reference(x, conv_w, conv_b):
    """Pure-JAX reference mirroring the PyTorch SpatialAttention forward."""
    K = conv_w.shape[-1]
    P = K // 2
    avg = jnp.mean(x, axis=1, keepdims=True)
    mx = jnp.max(x, axis=1, keepdims=True)
    pooled = jnp.concatenate([avg, mx], axis=1)                 # (B, 2, H, W)
    conv = jax.lax.conv_general_dilated(
        pooled, conv_w, window_strides=(1, 1),
        padding=((P, P), (P, P)),
        dimension_numbers=("NCHW", "OIHW", "NCHW"),
        precision=jax.lax.Precision.HIGHEST)
    conv = conv + conv_b.reshape(1, -1, 1, 1)
    return x * jax.nn.sigmoid(conv)


if __name__ == "__main__":
    # Small shapes consistent with the module. H*W = 256 is a multiple of 128,
    # so the big loads/stores are lane-dense.
    B, C, H, W = 2, 4, 16, 16
    K = 7

    key = jax.random.PRNGKey(0)
    kx_, kw_, kb_ = jax.random.split(key, 3)

    x = jax.random.normal(kx_, (B, C, H, W), dtype=jnp.float32)
    # PyTorch Conv2d(2, 1, 7) parameter shapes.
    conv_w = jax.random.normal(kw_, (1, 2, K, K), dtype=jnp.float32) * 0.1
    conv_b = jax.random.normal(kb_, (1,), dtype=jnp.float32) * 0.1

    y = spatial_attention(x, conv_w, conv_b)
    y = jax.block_until_ready(y)

    y_ref = _reference(x, conv_w, conv_b)
    assert y.shape == (B, C, H, W)
    assert jnp.allclose(y, y_ref, atol=1e-5, rtol=1e-5), "mismatch vs reference"

    print("KERNEL_OK")
</pallas_src>

<mosaic_0001>
module attributes {stable_mosaic.version = 11 : i64} {
  func.func @_spatial_attention_kernel(%arg0: i32, %arg1: memref<2x4x256xf32, #tpu.memory_space<vmem>>, %arg2: memref<99xf32, #tpu.memory_space<smem>>, %arg3: memref<2x4x256xf32, #tpu.memory_space<vmem>>, %arg4: memref<2x358xf32, #tpu.memory_space<vmem>>, %arg5: memref<2x358xf32, #tpu.memory_space<vmem>>) attributes {dimension_semantics = [#tpu.dimension_semantics<parallel>], iteration_bounds = array<i64: 1>, scalar_prefetch = 0 : i64, scratch_operands = 2 : i64, tpu.core_type = #tpu.core_type<tc>, window_params = [{transform_indices = @transform_0, window_bounds = array<i64: 2, 4, 256>}, {transform_indices = @transform_1, window_bounds = array<i64: 99>}, {transform_indices = @transform_2, window_bounds = array<i64: 2, 4, 256>}]} {
    %c0 = arith.constant 0 : index
    %c0_0 = arith.constant 0 : index
    %c0_1 = arith.constant 0 : index
    %0 = vector.load %arg1[%c0, %c0_0, %c0_1] : memref<2x4x256xf32, #tpu.memory_space<vmem>>, vector<2x4x256xf32>
    %cst = arith.constant dense<0.000000e+00> : vector<2x256xf32>
    %1 = vector.multi_reduction <add>, %0, %cst [1] : vector<2x4x256xf32> to vector<2x256xf32>
    %cst_2 = arith.constant 2.500000e-01 : f32
    %2 = vector.broadcast %cst_2 : f32 to vector<2x256xf32>
    %3 = arith.mulf %1, %2 : vector<2x256xf32>
    %cst_3 = arith.constant dense<0xFF800000> : vector<2x256xf32>
    %4 = vector.multi_reduction <maximumf>, %0, %cst_3 [1] : vector<2x4x256xf32> to vector<2x256xf32>
    %cst_4 = arith.constant 0.000000e+00 : f32
    %5 = vector.broadcast %cst_4 : f32 to vector<2x51xf32>
    %c0_5 = arith.constant 0 : index
    %c0_6 = arith.constant 0 : index
    %6 = vector.load %arg4[%c0_5, %c0_6] : memref<2x358xf32, #tpu.memory_space<vmem>>, vector<2x51xf32>
    tpu.vector_store %arg4[%c0_5, %c0_6], %5 {strides = array<i32>} : memref<2x358xf32, #tpu.memory_space<vmem>>, vector<2x51xf32>,
    %c0_7 = arith.constant 0 : index
    %c307 = arith.constant 307 : index
    %7 = vector.load %arg4[%c0_7, %c307] : memref<2x358xf32, #tpu.memory_space<vmem>>, vector<2x51xf32>
    tpu.vector_store %arg4[%c0_7, %c307], %5 {strides = array<i32>} : memref<2x358xf32, #tpu.memory_space<vmem>>, vector<2x51xf32>,
    %c0_8 = arith.constant 0 : index
    %c0_9 = arith.constant 0 : index
    %8 = vector.load %arg5[%c0_8, %c0_9] : memref<2x358xf32, #tpu.memory_space<vmem>>, vector<2x51xf32>
    tpu.vector_store %arg5[%c0_8, %c0_9], %5 {strides = array<i32>} : memref<2x358xf32, #tpu.memory_space<vmem>>, vector<2x51xf32>,
    %c0_10 = arith.constant 0 : index
    %c307_11 = arith.constant 307 : index
    %9 = vector.load %arg5[%c0_10, %c307_11] : memref<2x358xf32, #tpu.memory_space<vmem>>, vector<2x51xf32>
    tpu.vector_store %arg5[%c0_10, %c307_11], %5 {strides = array<i32>} : memref<2x358xf32, #tpu.memory_space<vmem>>, vector<2x51xf32>,
    %c0_12 = arith.constant 0 : index
    %c51 = arith.constant 51 : index
    %10 = vector.load %arg4[%c0_12, %c51] : memref<2x358xf32, #tpu.memory_space<vmem>>, vector<2x256xf32>
    tpu.vector_store %arg4[%c0_12, %c51], %3 {strides = array<i32>} : memref<2x358xf32, #tpu.memory_space<vmem>>, vector<2x256xf32>,
    %c0_13 = arith.constant 0 : index
    %c51_14 = arith.constant 51 : index
    %11 = vector.load %arg5[%c0_13, %c51_14] : memref<2x358xf32, #tpu.memory_space<vmem>>, vector<2x256xf32>
    tpu.vector_store %arg5[%c0_13, %c51_14], %4 {strides = array<i32>} : memref<2x358xf32, #tpu.memory_space<vmem>>, vector<2x256xf32>,
    %12 = tpu.iota {dimensions = array<i32: 1>} : vector<2x256xi32>
    %c16_i32 = arith.constant 16 : i32
    %c0_i32 = arith.constant 0 : i32
    %13 = arith.cmpi eq, %c16_i32, %c0_i32 : i32
    %c1_i32 = arith.constant 1 : i32
    %14 = arith.select %13, %c1_i32, %c16_i32 : i32
    %15 = vector.broadcast %14 : i32 to vector<2x256xi32>
    %16 = arith.remsi %12, %15 : vector<2x256xi32>
    %c0_i32_15 = arith.constant 0 : i32
    %17 = vector.broadcast %c0_i32_15 : i32 to vector<2x256xi32>
    %18 = arith.cmpi ne, %16, %17 : vector<2x256xi32>
    %c0_i32_16 = arith.constant 0 : i32
    %19 = vector.broadcast %c0_i32_16 : i32 to vector<2x256xi32>
    %20 = arith.cmpi slt, %16, %19 : vector<2x256xi32>
    %c0_i32_17 = arith.constant 0 : i32
    %21 = arith.cmpi slt, %14, %c0_i32_17 : i32
    %22 = vector.broadcast %21 : i1 to vector<2x256xi1>
    %23 = vector.broadcast %22 : vector<2x256xi1> to vector<2x256xi1>
    %24 = arith.xori %20, %23 : vector<2x256xi1>
    %25 = arith.andi %24, %18 : vector<2x256xi1>
    %26 = vector.broadcast %14 : i32 to vector<2x256xi32>
    %27 = arith.addi %16, %26 : vector<2x256xi32>
    %28 = arith.select %25, %27, %16 : vector<2x256xi1>, vector<2x256xi32>
    %cst_18 = arith.constant 0.000000e+00 : f32
    %29 = vector.broadcast %cst_18 : f32 to vector<2x256xf32>
    %cst_19 = arith.constant 0.000000e+00 : f32
    %30 = vector.broadcast %cst_19 : f32 to vector<2x256xf32>
    %cst_20 = arith.constant 0.000000e+00 : f32
    %31 = vector.broadcast %cst_20 : f32 to vector<2x256xf32>
    %c0_21 = arith.constant 0 : index
    %c0_22 = arith.constant 0 : index
    %32 = vector.load %arg4[%c0_21, %c0_22] : memref<2x358xf32, #tpu.memory_space<vmem>>, vector<2x256xf32>
    %c0_23 = arith.constant 0 : index
    %33 = memref.load %arg2[%c0_23] : memref<99xf32, #tpu.memory_space<smem>>
    %34 = vector.broadcast %33 : f32 to vector<2x256xf32>
    %35 = arith.mulf %32, %34 : vector<2x256xf32>
    %36 = arith.addf %30, %35 : vector<2x256xf32>
    %c0_24 = arith.constant 0 : index
    %c0_25 = arith.constant 0 : index
    %37 = vector.load %arg5[%c0_24, %c0_25] : memref<2x358xf32, #tpu.memory_space<vmem>>, vector<2x256xf32>
    %c49 = arith.constant 49 : index
    %38 = memref.load %arg2[%c49] : memref<99xf32, #tpu.memory_space<smem>>
    %39 = vector.broadcast %38 : f32 to vector<2x256xf32>
    %40 = arith.mulf %37, %39 : vector<2x256xf32>
    %41 = arith.addf %31, %40 : vector<2x256xf32>
    %c0_26 = arith.constant 0 : index
    %c16 = arith.constant 16 : index
    %42 = vector.load %arg4[%c0_26, %c16] : memref<2x358xf32, #tpu.memory_space<vmem>>, vector<2x256xf32>
    %c7 = arith.constant 7 : index
    %43 = memref.load %arg2[%c7] : memref<99xf32, #tpu.memory_space<smem>>
    %44 = vector.broadcast %43 : f32 to vector<2x256xf32>
    %45 = arith.mulf %42, %44 : vector<2x256xf32>
    %46 = arith.addf %36, %45 : vector<2x256xf32>
    %c0_27 = arith.constant 0 : index
    %c16_28 = arith.constant 16 : index
    %47 = vector.load %arg5[%c0_27, %c16_28] : memref<2x358xf32, #tpu.memory_space<vmem>>, vector<2x256xf32>
    %c56 = arith.constant 56 : index
    %48 = memref.load %arg2[%c56] : memref<99xf32, #tpu.memory_space<smem>>
    %49 = vector.broadcast %48 : f32 to vector<2x256xf32>
    %50 = arith.mulf %47, %49 : vector<2x256xf32>
    %51 = arith.addf %41, %50 : vector<2x256xf32>
    %c0_29 = arith.constant 0 : index
    %c32 = arith.constant 32 : index
    %52 = vector.load %arg4[%c0_29, %c32] : memref<2x358xf32, #tpu.memory_space<vmem>>, vector<2x256xf32>
    %c14 = arith.constant 14 : index
    %53 = memref.load %arg2[%c14] : memref<99xf32, #tpu.memory_space<smem>>
    %54 = vector.broadcast %53 : f32 to vector<2x256xf32>
    %55 = arith.mulf %52, %54 : vector<2x256xf32>
    %56 = arith.addf %46, %55 : vector<2x256xf32>
    %c0_30 = arith.constant 0 : index
    %c32_31 = arith.constant 32 : index
    %57 = vector.load %arg5[%c0_30, %c32_31] : memref<2x358xf32, #tpu.memory_space<vmem>>, vector<2x256xf32>
    %c63 = arith.constant 63 : index
    %58 = memref.load %arg2[%c63] : memref<99xf32, #tpu.memory_space<smem>>
    %59 = vector.broadcast %58 : f32 to vector<2x256xf32>
    %60 = arith.mulf %57, %59 : vector<2x256xf32>
    %61 = arith.addf %51, %60 : vector<2x256xf32>
    %c0_32 = arith.constant 0 : index
    %c48 = arith.constant 48 : index
    %62 = vector.load %arg4[%c0_32, %c48] : memref<2x358xf32, #tpu.memory_space<vmem>>, vector<2x256xf32>
    %c21 = arith.constant 21 : index
    %63 = memref.load %arg2[%c21] : memref<99xf32, #tpu.memory_space<smem>>
    %64 = vector.broadcast %63 : f32 to vector<2x256xf32>
    %65 = arith.mulf %62, %64 : vector<2x256xf32>
    %66 = arith.addf %56, %65 : vector<2x256xf32>
    %c0_33 = arith.constant 0 : index
    %c48_34 = arith.constant 48 : index
    %67 = vector.load %arg5[%c0_33, %c48_34] : memref<2x358xf32, #tpu.memory_space<vmem>>, vector<2x256xf32>
    %c70 = arith.constant 70 : index
    %68 = memref.load %arg2[%c70] : memref<99xf32, #tpu.memory_space<smem>>
    %69 = vector.broadcast %68 : f32 to vector<2x256xf32>
    %70 = arith.mulf %67, %69 : vector<2x256xf32>
    %71 = arith.addf %61, %70 : vector<2x256xf32>
    %c0_35 = arith.constant 0 : index
    %c64 = arith.constant 64 : index
    %72 = vector.load %arg4[%c0_35, %c64] : memref<2x358xf32, #tpu.memory_space<vmem>>, vector<2x256xf32>
    %c28 = arith.constant 28 : index
    %73 = memref.load %arg2[%c28] : memref<99xf32, #tpu.memory_space<smem>>
    %74 = vector.broadcast %73 : f32 to vector<2x256xf32>
    %75 = arith.mulf %72, %74 : vector<2x256xf32>
    %76 = arith.addf %66, %75 : vector<2x256xf32>
    %c0_36 = arith.constant 0 : index
    %c64_37 = arith.constant 64 : index
    %77 = vector.load %arg5[%c0_36, %c64_37] : memref<2x358xf32, #tpu.memory_space<vmem>>, vector<2x256xf32>
    %c77 = arith.constant 77 : index
    %78 = memref.load %arg2[%c77] : memref<99xf32, #tpu.memory_space<smem>>
    %79 = vector.broadcast %78 : f32 to vector<2x256xf32>
    %80 = arith.mulf %77, %79 : vector<2x256xf32>
    %81 = arith.addf %71, %80 : vector<2x256xf32>
    %c0_38 = arith.constant 0 : index
    %c80 = arith.constant 80 : index
    %82 = vector.load %arg4[%c0_38, %c80] : memref<2x358xf32, #tpu.memory_space<vmem>>, vector<2x256xf32>
    %c35 = arith.constant 35 : index
    %83 = memref.load %arg2[%c35] : memref<99xf32, #tpu.memory_space<smem>>
    %84 = vector.broadcast %83 : f32 to vector<2x256xf32>
    %85 = arith.mulf %82, %84 : vector<2x256xf32>
    %86 = arith.addf %76, %85 : vector<2x256xf32>
    %c0_39 = arith.constant 0 : index
    %c80_40 = arith.constant 80 : index
    %87 = vector.load %arg5[%c0_39, %c80_40] : memref<2x358xf32, #tpu.memory_space<vmem>>, vector<2x256xf32>
    %c84 = arith.constant 84 : index
    %88 = memref.load %arg2[%c84] : memref<99xf32, #tpu.memory_space<smem>>
    %89 = vector.broadcast %88 : f32 to vector<2x256xf32>
    %90 = arith.mulf %87, %89 : vector<2x256xf32>
    %91 = arith.addf %81, %90 : vector<2x256xf32>
    %c0_41 = arith.constant 0 : index
    %c96 = arith.constant 96 : index
    %92 = vector.load %arg4[%c0_41, %c96] : memref<2x358xf32, #tpu.memory_space<vmem>>, vector<2x256xf32>
    %c42 = arith.constant 42 : index
    %93 = memref.load %arg2[%c42] : memref<99xf32, #tpu.memory_space<smem>>
    %94 = vector.broadcast %93 : f32 to vector<2x256xf32>
    %95 = arith.mulf %92, %94 : vector<2x256xf32>
    %96 = arith.addf %86, %95 : vector<2x256xf32>
    %c0_42 = arith.constant 0 : index
    %c96_43 = arith.constant 96 : index
    %97 = vector.load %arg5[%c0_42, %c96_43] : memref<2x358xf32, #tpu.memory_space<vmem>>, vector<2x256xf32>
    %c91 = arith.constant 91 : index
    %98 = memref.load %arg2[%c91] : memref<99xf32, #tpu.memory_space<smem>>
    %99 = vector.broadcast %98 : f32 to vector<2x256xf32>
    %100 = arith.mulf %97, %99 : vector<2x256xf32>
    %101 = arith.addf %91, %100 : vector<2x256xf32>
    %102 = arith.addf %96, %101 : vector<2x256xf32>
    %c3_i32 = arith.constant 3 : i32
    %103 = vector.broadcast %c3_i32 : i32 to vector<2x256xi32>
    %104 = arith.cmpi sge, %28, %103 : vector<2x256xi32>
    %cst_44 = arith.constant 0.000000e+00 : f32
    %105 = vector.broadcast %cst_44 : f32 to vector<2x256xf32>
    %106 = arith.select %104, %102, %105 : vector<2x256xi1>, vector<2x256xf32>
    %107 = arith.addf %29, %106 : vector<2x256xf32>
    %cst_45 = arith.constant 0.000000e+00 : f32
    %108 = vector.broadcast %cst_45 : f32 to vector<2x256xf32>
    %cst_46 = arith.constant 0.000000e+00 : f32
    %109 = vector.broadcast %cst_46 : f32 to vector<2x256xf32>
    %c0_47 = arith.constant 0 : index
    %c1 = arith.constant 1 : index
    %110 = vector.load %arg4[%c0_47, %c1] : memref<2x358xf32, #tpu.memory_space<vmem>>, vector<2x256xf32>
    %c1_48 = arith.constant 1 : index
    %111 = memref.load %arg2[%c1_48] : memref<99xf32, #tpu.memory_space<smem>>
    %112 = vector.broadcast %111 : f32 to vector<2x256xf32>
    %113 = arith.mulf %110, %112 : vector<2x256xf32>
    %114 = arith.addf %108, %113 : vector<2x256xf32>
    %c0_49 = arith.constant 0 : index
    %c1_50 = arith.constant 1 : index
    %115 = vector.load %arg5[%c0_49, %c1_50] : memref<2x358xf32, #tpu.memory_space<vmem>>, vector<2x256xf32>
    %c50 = arith.constant 50 : index
    %116 = memref.load %arg2[%c50] : memref<99xf32, #tpu.memory_space<smem>>
    %117 = vector.broadcast %116 : f32 to vector<2x256xf32>
    %118 = arith.mulf %115, %117 : vector<2x256xf32>
    %119 = arith.addf %109, %118 : vector<2x256xf32>
    %c0_51 = arith.constant 0 : index
    %c17 = arith.constant 17 : index
    %120 = vector.load %arg4[%c0_51, %c17] : memref<2x358xf32, #tpu.memory_space<vmem>>, vector<2x256xf32>
    %c8 = arith.constant 8 : index
    %121 = memref.load %arg2[%c8] : memref<99xf32, #tpu.memory_space<smem>>
    %122 = vector.broadcast %121 : f32 to vector<2x256xf32>
    %123 = arith.mulf %120, %122 : vector<2x256xf32>
    %124 = arith.addf %114, %123 : vector<2x256xf32>
    %c0_52 = arith.constant 0 : index
    %c17_53 = arith.constant 17 : index
    %125 = vector.load %arg5[%c0_52, %c17_53] : memref<2x358xf32, #tpu.memory_space<vmem>>, vector<2x256xf32>
    %c57 = arith.constant 57 : index
    %126 = memref.load %arg2[%c57] : memref<99xf32, #tpu.memory_space<smem>>
    %127 = vector.broadcast %126 : f32 to vector<2x256xf32>
    %128 = arith.mulf %125, %127 : vector<2x256xf32>
    %129 = arith.addf %119, %128 : vector<2x256xf32>
    %c0_54 = arith.constant 0 : index
    %c33 = arith.constant 33 : index
    %130 = vector.load %arg4[%c0_54, %c33] : memref<2x358xf32, #tpu.memory_space<vmem>>, vector<2x256xf32>
    %c15 = arith.constant 15 : index
    %131 = memref.load %arg2[%c15] : memref<99xf32, #tpu.memory_space<smem>>
    %132 = vector.broadcast %131 : f32 to vector<2x256xf32>
    %133 = arith.mulf %130, %132 : vector<2x256xf32>
    %134 = arith.addf %124, %133 : vector<2x256xf32>
    %c0_55 = arith.constant 0 : index
    %c33_56 = arith.constant 33 : index
    %135 = vector.load %arg5[%c0_55, %c33_56] : memref<2x358xf32, #tpu.memory_space<vmem>>, vector<2x256xf32>
    %c64_57 = arith.constant 64 : index
    %136 = memref.load %arg2[%c64_57] : memref<99xf32, #tpu.memory_space<smem>>
    %137 = vector.broadcast %136 : f32 to vector<2x256xf32>
    %138 = arith.mulf %135, %137 : vector<2x256xf32>
    %139 = arith.addf %129, %138 : vector<2x256xf32>
    %c0_58 = arith.constant 0 : index
    %c49_59 = arith.constant 49 : index
    %140 = vector.load %arg4[%c0_58, %c49_59] : memref<2x358xf32, #tpu.memory_space<vmem>>, vector<2x256xf32>
    %c22 = arith.constant 22 : index
    %141 = memref.load %arg2[%c22] : memref<99xf32, #tpu.memory_space<smem>>
    %142 = vector.broadcast %141 : f32 to vector<2x256xf32>
    %143 = arith.mulf %140, %142 : vector<2x256xf32>
    %144 = arith.addf %134, %143 : vector<2x256xf32>
    %c0_60 = arith.constant 0 : index
    %c49_61 = arith.constant 49 : index
    %145 = vector.load %arg5[%c0_60, %c49_61] : memref<2x358xf32, #tpu.memory_space<vmem>>, vector<2x256xf32>
    %c71 = arith.constant 71 : index
    %146 = memref.load %arg2[%c71] : memref<99xf32, #tpu.memory_space<smem>>
    %147 = vector.broadcast %146 : f32 to vector<2x256xf32>
    %148 = arith.mulf %145, %147 : vector<2x256xf32>
    %149 = arith.addf %139, %148 : vector<2x256xf32>
    %c0_62 = arith.constant 0 : index
    %c65 = arith.constant 65 : index
    %150 = vector.load %arg4[%c0_62, %c65] : memref<2x358xf32, #tpu.memory_space<vmem>>, vector<2x256xf32>
    %c29 = arith.constant 29 : index
    %151 = memref.load %arg2[%c29] : memref<99xf32, #tpu.memory_space<smem>>
    %152 = vector.broadcast %151 : f32 to vector<2x256xf32>
    %153 = arith.mulf %150, %152 : vector<2x256xf32>
    %154 = arith.addf %144, %153 : vector<2x256xf32>
    %c0_63 = arith.constant 0 : index
    %c65_64 = arith.constant 65 : index
    %155 = vector.load %arg5[%c0_63, %c65_64] : memref<2x358xf32, #tpu.memory_space<vmem>>, vector<2x256xf32>
    %c78 = arith.constant 78 : index
    %156 = memref.load %arg2[%c78] : memref<99xf32, #tpu.memory_space<smem>>
    %157 = vector.broadcast %156 : f32 to vector<2x256xf32>
    %158 = arith.mulf %155, %157 : vector<2x256xf32>
    %159 = arith.addf %149, %158 : vector<2x256xf32>
    %c0_65 = arith.constant 0 : index
    %c81 = arith.constant 81 : index
    %160 = vector.load %arg4[%c0_65, %c81] : memref<2x358xf32, #tpu.memory_space<vmem>>, vector<2x256xf32>
    %c36 = arith.constant 36 : index
    %161 = memref.load %arg2[%c36] : memref<99xf32, #tpu.memory_space<smem>>
    %162 = vector.broadcast %161 : f32 to vector<2x256xf32>
    %163 = arith.mulf %160, %162 : vector<2x256xf32>
    %164 = arith.addf %154, %163 : vector<2x256xf32>
    %c0_66 = arith.constant 0 : index
    %c81_67 = arith.constant 81 : index
    %165 = vector.load %arg5[%c0_66, %c81_67] : memref<2x358xf32, #tpu.memory_space<vmem>>, vector<2x256xf32>
    %c85 = arith.constant 85 : index
    %166 = memref.load %arg2[%c85] : memref<99xf32, #tpu.memory_space<smem>>
    %167 = vector.broadcast %166 : f32 to vector<2x256xf32>
    %168 = arith.mulf %165, %167 : vector<2x256xf32>
    %169 = arith.addf %159, %168 : vector<2x256xf32>
    %c0_68 = arith.constant 0 : index
    %c97 = arith.constant 97 : index
    %170 = vector.load %arg4[%c0_68, %c97] : memref<2x358xf32, #tpu.memory_space<vmem>>, vector<2x256xf32>
    %c43 = arith.constant 43 : index
    %171 = memref.load %arg2[%c43] : memref<99xf32, #tpu.memory_space<smem>>
    %172 = vector.broadcast %171 : f32 to vector<2x256xf32>
    %173 = arith.mulf %170, %172 : vector<2x256xf32>
    %174 = arith.addf %164, %173 : vector<2x256xf32>
    %c0_69 = arith.constant 0 : index
    %c97_70 = arith.constant 97 : index
    %175 = vector.load %arg5[%c0_69, %c97_70] : memref<2x358xf32, #tpu.memory_space<vmem>>, vector<2x256xf32>
    %c92 = arith.constant 92 : index
    %176 = memref.load %arg2[%c92] : memref<99xf32, #tpu.memory_space<smem>>
    %177 = vector.broadcast %176 : f32 to vector<2x256xf32>
    %178 = arith.mulf %175, %177 : vector<2x256xf32>
    %179 = arith.addf %169, %178 : vector<2x256xf32>
    %180 = arith.addf %174, %179 : vector<2x256xf32>
    %c2_i32 = arith.constant 2 : i32
    %181 = vector.broadcast %c2_i32 : i32 to vector<2x256xi32>
    %182 = arith.cmpi sge, %28, %181 : vector<2x256xi32>
    %cst_71 = arith.constant 0.000000e+00 : f32
    %183 = vector.broadcast %cst_71 : f32 to vector<2x256xf32>
    %184 = arith.select %182, %180, %183 : vector<2x256xi1>, vector<2x256xf32>
    %185 = arith.addf %107, %184 : vector<2x256xf32>
    %cst_72 = arith.constant 0.000000e+00 : f32
    %186 = vector.broadcast %cst_72 : f32 to vector<2x256xf32>
    %cst_73 = arith.constant 0.000000e+00 : f32
    %187 = vector.broadcast %cst_73 : f32 to vector<2x256xf32>
    %c0_74 = arith.constant 0 : index
    %c2 = arith.constant 2 : index
    %188 = vector.load %arg4[%c0_74, %c2] : memref<2x358xf32, #tpu.memory_space<vmem>>, vector<2x256xf32>
    %c2_75 = arith.constant 2 : index
    %189 = memref.load %arg2[%c2_75] : memref<99xf32, #tpu.memory_space<smem>>
    %190 = vector.broadcast %189 : f32 to vector<2x256xf32>
    %191 = arith.mulf %188, %190 : vector<2x256xf32>
    %192 = arith.addf %186, %191 : vector<2x256xf32>
    %c0_76 = arith.constant 0 : index
    %c2_77 = arith.constant 2 : index
    %193 = vector.load %arg5[%c0_76, %c2_77] : memref<2x358xf32, #tpu.memory_space<vmem>>, vector<2x256xf32>
    %c51_78 = arith.constant 51 : index
    %194 = memref.load %arg2[%c51_78] : memref<99xf32, #tpu.memory_space<smem>>
    %195 = vector.broadcast %194 : f32 to vector<2x256xf32>
    %196 = arith.mulf %193, %195 : vector<2x256xf32>
    %197 = arith.addf %187, %196 : vector<2x256xf32>
    %c0_79 = arith.constant 0 : index
    %c18 = arith.constant 18 : index
    %198 = vector.load %arg4[%c0_79, %c18] : memref<2x358xf32, #tpu.memory_space<vmem>>, vector<2x256xf32>
    %c9 = arith.constant 9 : index
    %199 = memref.load %arg2[%c9] : memref<99xf32, #tpu.memory_space<smem>>
    %200 = vector.broadcast %199 : f32 to vector<2x256xf32>
    %201 = arith.mulf %198, %200 : vector<2x256xf32>
    %202 = arith.addf %192, %201 : vector<2x256xf32>
    %c0_80 = arith.constant 0 : index
    %c18_81 = arith.constant 18 : index
    %203 = vector.load %arg5[%c0_80, %c18_81] : memref<2x358xf32, #tpu.memory_space<vmem>>, vector<2x256xf32>
    %c58 = arith.constant 58 : index
    %204 = memref.load %arg2[%c58] : memref<99xf32, #tpu.memory_space<smem>>
    %205 = vector.broadcast %204 : f32 to vector<2x256xf32>
    %206 = arith.mulf %203, %205 : vector<2x256xf32>
    %207 = arith.addf %197, %206 : vector<2x256xf32>
    %c0_82 = arith.constant 0 : index
    %c34 = arith.constant 34 : index
    %208 = vector.load %arg4[%c0_82, %c34] : memref<2x358xf32, #tpu.memory_space<vmem>>, vector<2x256xf32>
    %c16_83 = arith.constant 16 : index
    %209 = memref.load %arg2[%c16_83] : memref<99xf32, #tpu.memory_space<smem>>
    %210 = vector.broadcast %209 : f32 to vector<2x256xf32>
    %211 = arith.mulf %208, %210 : vector<2x256xf32>
    %212 = arith.addf %202, %211 : vector<2x256xf32>
    %c0_84 = arith.constant 0 : index
    %c34_85 = arith.constant 34 : index
    %213 = vector.load %arg5[%c0_84, %c34_85] : memref<2x358xf32, #tpu.memory_space<vmem>>, vector<2x256xf32>
    %c65_86 = arith.constant 65 : index
    %214 = memref.load %arg2[%c65_86] : memref<99xf32, #tpu.memory_space<smem>>
    %215 = vector.broadcast %214 : f32 to vector<2x256xf32>
    %216 = arith.mulf %213, %215 : vector<2x256xf32>
    %217 = arith.addf %207, %216 : vector<2x256xf32>
    %c0_87 = arith.constant 0 : index
    %c50_88 = arith.constant 50 : index
    %218 = vector.load %arg4[%c0_87, %c50_88] : memref<2x358xf32, #tpu.memory_space<vmem>>, vector<2x256xf32>
    %c23 = arith.constant 23 : index
    %219 = memref.load %arg2[%c23] : memref<99xf32, #tpu.memory_space<smem>>
    %220 = vector.broadcast %219 : f32 to vector<2x256xf32>
    %221 = arith.mulf %218, %220 : vector<2x256xf32>
    %222 = arith.addf %212, %221 : vector<2x256xf32>
    %c0_89 = arith.constant 0 : index
    %c50_90 = arith.constant 50 : index
    %223 = vector.load %arg5[%c0_89, %c50_90] : memref<2x358xf32, #tpu.memory_space<vmem>>, vector<2x256xf32>
    %c72 = arith.constant 72 : index
    %224 = memref.load %arg2[%c72] : memref<99xf32, #tpu.memory_space<smem>>
    %225 = vector.broadcast %224 : f32 to vector<2x256xf32>
    %226 = arith.mulf %223, %225 : vector<2x256xf32>
    %227 = arith.addf %217, %226 : vector<2x256xf32>
    %c0_91 = arith.constant 0 : index
    %c66 = arith.constant 66 : index
    %228 = vector.load %arg4[%c0_91, %c66] : memref<2x358xf32, #tpu.memory_space<vmem>>, vector<2x256xf32>
    %c30 = arith.constant 30 : index
    %229 = memref.load %arg2[%c30] : memref<99xf32, #tpu.memory_space<smem>>
    %230 = vector.broadcast %229 : f32 to vector<2x256xf32>
    %231 = arith.mulf %228, %230 : vector<2x256xf32>
    %232 = arith.addf %222, %231 : vector<2x256xf32>
    %c0_92 = arith.constant 0 : index
    %c66_93 = arith.constant 66 : index
    %233 = vector.load %arg5[%c0_92, %c66_93] : memref<2x358xf32, #tpu.memory_space<vmem>>, vector<2x256xf32>
    %c79 = arith.constant 79 : index
    %234 = memref.load %arg2[%c79] : memref<99xf32, #tpu.memory_space<smem>>
    %235 = vector.broadcast %234 : f32 to vector<2x256xf32>
    %236 = arith.mulf %233, %235 : vector<2x256xf32>
    %237 = arith.addf %227, %236 : vector<2x256xf32>
    %c0_94 = arith.constant 0 : index
    %c82 = arith.constant 82 : index
    %238 = vector.load %arg4[%c0_94, %c82] : memref<2x358xf32, #tpu.memory_space<vmem>>, vector<2x256xf32>
    %c37 = arith.constant 37 : index
    %239 = memref.load %arg2[%c37] : memref<99xf32, #tpu.memory_space<smem>>
    %240 = vector.broadcast %239 : f32 to vector<2x256xf32>
    %241 = arith.mulf %238, %240 : vector<2x256xf32>
    %242 = arith.addf %232, %241 : vector<2x256xf32>
    %c0_95 = arith.constant 0 : index
    %c82_96 = arith.constant 82 : index
    %243 = vector.load %arg5[%c0_95, %c82_96] : memref<2x358xf32, #tpu.memory_space<vmem>>, vector<2x256xf32>
    %c86 = arith.constant 86 : index
    %244 = memref.load %arg2[%c86] : memref<99xf32, #tpu.memory_space<smem>>
    %245 = vector.broadcast %244 : f32 to vector<2x256xf32>
    %246 = arith.mulf %243, %245 : vector<2x256xf32>
    %247 = arith.addf %237, %246 : vector<2x256xf32>
    %c0_97 = arith.constant 0 : index
    %c98 = arith.constant 98 : index
    %248 = vector.load %arg4[%c0_97, %c98] : memref<2x358xf32, #tpu.memory_space<vmem>>, vector<2x256xf32>
    %c44 = arith.constant 44 : index
    %249 = memref.load %arg2[%c44] : memref<99xf32, #tpu.memory_space<smem>>
    %250 = vector.broadcast %249 : f32 to vector<2x256xf32>
    %251 = arith.mulf %248, %250 : vector<2x256xf32>
    %252 = arith.addf %242, %251 : vector<2x256xf32>
    %c0_98 = arith.constant 0 : index
    %c98_99 = arith.constant 98 : index
    %253 = vector.load %arg5[%c0_98, %c98_99] : memref<2x358xf32, #tpu.memory_space<vmem>>, vector<2x256xf32>
    %c93 = arith.constant 93 : index
    %254 = memref.load %arg2[%c93] : memref<99xf32, #tpu.memory_space<smem>>
    %255 = vector.broadcast %254 : f32 to vector<2x256xf32>
    %256 = arith.mulf %253, %255 : vector<2x256xf32>
    %257 = arith.addf %247, %256 : vector<2x256xf32>
    %258 = arith.addf %252, %257 : vector<2x256xf32>
    %c1_i32_100 = arith.constant 1 : i32
    %259 = vector.broadcast %c1_i32_100 : i32 to vector<2x256xi32>
    %260 = arith.cmpi sge, %28, %259 : vector<2x256xi32>
    %cst_101 = arith.constant 0.000000e+00 : f32
    %261 = vector.broadcast %cst_101 : f32 to vector<2x256xf32>
    %262 = arith.select %260, %258, %261 : vector<2x256xi1>, vector<2x256xf32>
    %263 = arith.addf %185, %262 : vector<2x256xf32>
    %cst_102 = arith.constant 0.000000e+00 : f32
    %264 = vector.broadcast %cst_102 : f32 to vector<2x256xf32>
    %cst_103 = arith.constant 0.000000e+00 : f32
    %265 = vector.broadcast %cst_103 : f32 to vector<2x256xf32>
    %c0_104 = arith.constant 0 : index
    %c3 = arith.constant 3 : index
    %266 = vector.load %arg4[%c0_104, %c3] : memref<2x358xf32, #tpu.memory_space<vmem>>, vector<2x256xf32>
    %c3_105 = arith.constant 3 : index
    %267 = memref.load %arg2[%c3_105] : memref<99xf32, #tpu.memory_space<smem>>
    %268 = vector.broadcast %267 : f32 to vector<2x256xf32>
    %269 = arith.mulf %266, %268 : vector<2x256xf32>
    %270 = arith.addf %264, %269 : vector<2x256xf32>
    %c0_106 = arith.constant 0 : index
    %c3_107 = arith.constant 3 : index
    %271 = vector.load %arg5[%c0_106, %c3_107] : memref<2x358xf32, #tpu.memory_space<vmem>>, vector<2x256xf32>
    %c52 = arith.constant 52 : index
    %272 = memref.load %arg2[%c52] : memref<99xf32, #tpu.memory_space<smem>>
    %273 = vector.broadcast %272 : f32 to vector<2x256xf32>
    %274 = arith.mulf %271, %273 : vector<2x256xf32>
    %275 = arith.addf %265, %274 : vector<2x256xf32>
    %c0_108 = arith.constant 0 : index
    %c19 = arith.constant 19 : index
    %276 = vector.load %arg4[%c0_108, %c19] : memref<2x358xf32, #tpu.memory_space<vmem>>, vector<2x256xf32>
    %c10 = arith.constant 10 : index
    %277 = memref.load %arg2[%c10] : memref<99xf32, #tpu.memory_space<smem>>
    %278 = vector.broadcast %277 : f32 to vector<2x256xf32>
    %279 = arith.mulf %276, %278 : vector<2x256xf32>
    %280 = arith.addf %270, %279 : vector<2x256xf32>
    %c0_109 = arith.constant 0 : index
    %c19_110 = arith.constant 19 : index
    %281 = vector.load %arg5[%c0_109, %c19_110] : memref<2x358xf32, #tpu.memory_space<vmem>>, vector<2x256xf32>
    %c59 = arith.constant 59 : index
    %282 = memref.load %arg2[%c59] : memref<99xf32, #tpu.memory_space<smem>>
    %283 = vector.broadcast %282 : f32 to vector<2x256xf32>
    %284 = arith.mulf %281, %283 : vector<2x256xf32>
    %285 = arith.addf %275, %284 : vector<2x256xf32>
    %c0_111 = arith.constant 0 : index
    %c35_112 = arith.constant 35 : index
    %286 = vector.load %arg4[%c0_111, %c35_112] : memref<2x358xf32, #tpu.memory_space<vmem>>, vector<2x256xf32>
    %c17_113 = arith.constant 17 : index
    %287 = memref.load %arg2[%c17_113] : memref<99xf32, #tpu.memory_space<smem>>
    %288 = vector.broadcast %287 : f32 to vector<2x256xf32>
    %289 = arith.mulf %286, %288 : vector<2x256xf32>
    %290 = arith.addf %280, %289 : vector<2x256xf32>
    %c0_114 = arith.constant 0 : index
    %c35_115 = arith.constant 35 : index
    %291 = vector.load %arg5[%c0_114, %c35_115] : memref<2x358xf32, #tpu.memory_space<vmem>>, vector<2x256xf32>
    %c66_116 = arith.constant 66 : index
    %292 = memref.load %arg2[%c66_116] : memref<99xf32, #tpu.memory_space<smem>>
    %293 = vector.broadcast %292 : f32 to vector<2x256xf32>
    %294 = arith.mulf %291, %293 : vector<2x256xf32>
    %295 = arith.addf %285, %294 : vector<2x256xf32>
    %c0_117 = arith.constant 0 : index
    %c51_118 = arith.constant 51 : index
    %296 = vector.load %arg4[%c0_117, %c51_118] : memref<2x358xf32, #tpu.memory_space<vmem>>, vector<2x256xf32>
    %c24 = arith.constant 24 : index
    %297 = memref.load %arg2[%c24] : memref<99xf32, #tpu.memory_space<smem>>
    %298 = vector.broadcast %297 : f32 to vector<2x256xf32>
    %299 = arith.mulf %296, %298 : vector<2x256xf32>
    %300 = arith.addf %290, %299 : vector<2x256xf32>
    %c0_119 = arith.constant 0 : index
    %c51_120 = arith.constant 51 : index
    %301 = vector.load %arg5[%c0_119, %c51_120] : memref<2x358xf32, #tpu.memory_space<vmem>>, vector<2x256xf32>
    %c73 = arith.constant 73 : index
    %302 = memref.load %arg2[%c73] : memref<99xf32, #tpu.memory_space<smem>>
    %303 = vector.broadcast %302 : f32 to vector<2x256xf32>
    %304 = arith.mulf %301, %303 : vector<2x256xf32>
    %305 = arith.addf %295, %304 : vector<2x256xf32>
    %c0_121 = arith.constant 0 : index
    %c67 = arith.constant 67 : index
    %306 = vector.load %arg4[%c0_121, %c67] : memref<2x358xf32, #tpu.memory_space<vmem>>, vector<2x256xf32>
    %c31 = arith.constant 31 : index
    %307 = memref.load %arg2[%c31] : memref<99xf32, #tpu.memory_space<smem>>
    %308 = vector.broadcast %307 : f32 to vector<2x256xf32>
    %309 = arith.mulf %306, %308 : vector<2x256xf32>
    %310 = arith.addf %300, %309 : vector<2x256xf32>
    %c0_122 = arith.constant 0 : index
    %c67_123 = arith.constant 67 : index
    %311 = vector.load %arg5[%c0_122, %c67_123] : memref<2x358xf32, #tpu.memory_space<vmem>>, vector<2x256xf32>
    %c80_124 = arith.constant 80 : index
    %312 = memref.load %arg2[%c80_124] : memref<99xf32, #tpu.memory_space<smem>>
    %313 = vector.broadcast %312 : f32 to vector<2x256xf32>
    %314 = arith.mulf %311, %313 : vector<2x256xf32>
    %315 = arith.addf %305, %314 : vector<2x256xf32>
    %c0_125 = arith.constant 0 : index
    %c83 = arith.constant 83 : index
    %316 = vector.load %arg4[%c0_125, %c83] : memref<2x358xf32, #tpu.memory_space<vmem>>, vector<2x256xf32>
    %c38 = arith.constant 38 : index
    %317 = memref.load %arg2[%c38] : memref<99xf32, #tpu.memory_space<smem>>
    %318 = vector.broadcast %317 : f32 to vector<2x256xf32>
    %319 = arith.mulf %316, %318 : vector<2x256xf32>
    %320 = arith.addf %310, %319 : vector<2x256xf32>
    %c0_126 = arith.constant 0 : index
    %c83_127 = arith.constant 83 : index
    %321 = vector.load %arg5[%c0_126, %c83_127] : memref<2x358xf32, #tpu.memory_space<vmem>>, vector<2x256xf32>
    %c87 = arith.constant 87 : index
    %322 = memref.load %arg2[%c87] : memref<99xf32, #tpu.memory_space<smem>>
    %323 = vector.broadcast %322 : f32 to vector<2x256xf32>
    %324 = arith.mulf %321, %323 : vector<2x256xf32>
    %325 = arith.addf %315, %324 : vector<2x256xf32>
    %c0_128 = arith.constant 0 : index
    %c99 = arith.constant 99 : index
    %326 = vector.load %arg4[%c0_128, %c99] : memref<2x358xf32, #tpu.memory_space<vmem>>, vector<2x256xf32>
    %c45 = arith.constant 45 : index
    %327 = memref.load %arg2[%c45] : memref<99xf32, #tpu.memory_space<smem>>
    %328 = vector.broadcast %327 : f32 to vector<2x256xf32>
    %329 = arith.mulf %326, %328 : vector<2x256xf32>
    %330 = arith.addf %320, %329 : vector<2x256xf32>
    %c0_129 = arith.constant 0 : index
    %c99_130 = arith.constant 99 : index
    %331 = vector.load %arg5[%c0_129, %c99_130] : memref<2x358xf32, #tpu.memory_space<vmem>>, vector<2x256xf32>
    %c94 = arith.constant 94 : index
    %332 = memref.load %arg2[%c94] : memref<99xf32, #tpu.memory_space<smem>>
    %333 = vector.broadcast %332 : f32 to vector<2x256xf32>
    %334 = arith.mulf %331, %333 : vector<2x256xf32>
    %335 = arith.addf %325, %334 : vector<2x256xf32>
    %336 = arith.addf %330, %335 : vector<2x256xf32>
    %337 = arith.addf %263, %336 : vector<2x256xf32>
    %cst_131 = arith.constant 0.000000e+00 : f32
    %338 = vector.broadcast %cst_131 : f32 to vector<2x256xf32>
    %cst_132 = arith.constant 0.000000e+00 : f32
    %339 = vector.broadcast %cst_132 : f32 to vector<2x256xf32>
    %c0_133 = arith.constant 0 : index
    %c4 = arith.constant 4 : index
    %340 = vector.load %arg4[%c0_133, %c4] : memref<2x358xf32, #tpu.memory_space<vmem>>, vector<2x256xf32>
    %c4_134 = arith.constant 4 : index
    %341 = memref.load %arg2[%c4_134] : memref<99xf32, #tpu.memory_space<smem>>
    %342 = vector.broadcast %341 : f32 to vector<2x256xf32>
    %343 = arith.mulf %340, %342 : vector<2x256xf32>
    %344 = arith.addf %338, %343 : vector<2x256xf32>
    %c0_135 = arith.constant 0 : index
    %c4_136 = arith.constant 4 : index
    %345 = vector.load %arg5[%c0_135, %c4_136] : memref<2x358xf32, #tpu.memory_space<vmem>>, vector<2x256xf32>
    %c53 = arith.constant 53 : index
    %346 = memref.load %arg2[%c53] : memref<99xf32, #tpu.memory_space<smem>>
    %347 = vector.broadcast %346 : f32 to vector<2x256xf32>
    %348 = arith.mulf %345, %347 : vector<2x256xf32>
    %349 = arith.addf %339, %348 : vector<2x256xf32>
    %c0_137 = arith.constant 0 : index
    %c20 = arith.constant 20 : index
    %350 = vector.load %arg4[%c0_137, %c20] : memref<2x358xf32, #tpu.memory_space<vmem>>, vector<2x256xf32>
    %c11 = arith.constant 11 : index
    %351 = memref.load %arg2[%c11] : memref<99xf32, #tpu.memory_space<smem>>
    %352 = vector.broadcast %351 : f32 to vector<2x256xf32>
    %353 = arith.mulf %350, %352 : vector<2x256xf32>
    %354 = arith.addf %344, %353 : vector<2x256xf32>
    %c0_138 = arith.constant 0 : index
    %c20_139 = arith.constant 20 : index
    %355 = vector.load %arg5[%c0_138, %c20_139] : memref<2x358xf32, #tpu.memory_space<vmem>>, vector<2x256xf32>
    %c60 = arith.constant 60 : index
    %356 = memref.load %arg2[%c60] : memref<99xf32, #tpu.memory_space<smem>>
    %357 = vector.broadcast %356 : f32 to vector<2x256xf32>
    %358 = arith.mulf %355, %357 : vector<2x256xf32>
    %359 = arith.addf %349, %358 : vector<2x256xf32>
    %c0_140 = arith.constant 0 : index
    %c36_141 = arith.constant 36 : index
    %360 = vector.load %arg4[%c0_140, %c36_141] : memref<2x358xf32, #tpu.memory_space<vmem>>, vector<2x256xf32>
    %c18_142 = arith.constant 18 : index
    %361 = memref.load %arg2[%c18_142] : memref<99xf32, #tpu.memory_space<smem>>
    %362 = vector.broadcast %361 : f32 to vector<2x256xf32>
    %363 = arith.mulf %360, %362 : vector<2x256xf32>
    %364 = arith.addf %354, %363 : vector<2x256xf32>
    %c0_143 = arith.constant 0 : index
    %c36_144 = arith.constant 36 : index
    %365 = vector.load %arg5[%c0_143, %c36_144] : memref<2x358xf32, #tpu.memory_space<vmem>>, vector<2x256xf32>
    %c67_145 = arith.constant 67 : index
    %366 = memref.load %arg2[%c67_145] : memref<99xf32, #tpu.memory_space<smem>>
    %367 = vector.broadcast %366 : f32 to vector<2x256xf32>
    %368 = arith.mulf %365, %367 : vector<2x256xf32>
    %369 = arith.addf %359, %368 : vector<2x256xf32>
    %c0_146 = arith.constant 0 : index
    %c52_147 = arith.constant 52 : index
    %370 = vector.load %arg4[%c0_146, %c52_147] : memref<2x358xf32, #tpu.memory_space<vmem>>, vector<2x256xf32>
    %c25 = arith.constant 25 : index
    %371 = memref.load %arg2[%c25] : memref<99xf32, #tpu.memory_space<smem>>
    %372 = vector.broadcast %371 : f32 to vector<2x256xf32>
    %373 = arith.mulf %370, %372 : vector<2x256xf32>
    %374 = arith.addf %364, %373 : vector<2x256xf32>
    %c0_148 = arith.constant 0 : index
    %c52_149 = arith.constant 52 : index
    %375 = vector.load %arg5[%c0_148, %c52_149] : memref<2x358xf32, #tpu.memory_space<vmem>>, vector<2x256xf32>
    %c74 = arith.constant 74 : index
    %376 = memref.load %arg2[%c74] : memref<99xf32, #tpu.memory_space<smem>>
    %377 = vector.broadcast %376 : f32 to vector<2x256xf32>
    %378 = arith.mulf %375, %377 : vector<2x256xf32>
    %379 = arith.addf %369, %378 : vector<2x256xf32>
    %c0_150 = arith.constant 0 : index
    %c68 = arith.constant 68 : index
    %380 = vector.load %arg4[%c0_150, %c68] : memref<2x358xf32, #tpu.memory_space<vmem>>, vector<2x256xf32>
    %c32_151 = arith.constant 32 : index
    %381 = memref.load %arg2[%c32_151] : memref<99xf32, #tpu.memory_space<smem>>
    %382 = vector.broadcast %381 : f32 to vector<2x256xf32>
    %383 = arith.mulf %380, %382 : vector<2x256xf32>
    %384 = arith.addf %374, %383 : vector<2x256xf32>
    %c0_152 = arith.constant 0 : index
    %c68_153 = arith.constant 68 : index
    %385 = vector.load %arg5[%c0_152, %c68_153] : memref<2x358xf32, #tpu.memory_space<vmem>>, vector<2x256xf32>
    %c81_154 = arith.constant 81 : index
    %386 = memref.load %arg2[%c81_154] : memref<99xf32, #tpu.memory_space<smem>>
    %387 = vector.broadcast %386 : f32 to vector<2x256xf32>
    %388 = arith.mulf %385, %387 : vector<2x256xf32>
    %389 = arith.addf %379, %388 : vector<2x256xf32>
    %c0_155 = arith.constant 0 : index
    %c84_156 = arith.constant 84 : index
    %390 = vector.load %arg4[%c0_155, %c84_156] : memref<2x358xf32, #tpu.memory_space<vmem>>, vector<2x256xf32>
    %c39 = arith.constant 39 : index
    %391 = memref.load %arg2[%c39] : memref<99xf32, #tpu.memory_space<smem>>
    %392 = vector.broadcast %391 : f32 to vector<2x256xf32>
    %393 = arith.mulf %390, %392 : vector<2x256xf32>
    %394 = arith.addf %384, %393 : vector<2x256xf32>
    %c0_157 = arith.constant 0 : index
    %c84_158 = arith.constant 84 : index
    %395 = vector.load %arg5[%c0_157, %c84_158] : memref<2x358xf32, #tpu.memory_space<vmem>>, vector<2x256xf32>
    %c88 = arith.constant 88 : index
    %396 = memref.load %arg2[%c88] : memref<99xf32, #tpu.memory_space<smem>>
    %397 = vector.broadcast %396 : f32 to vector<2x256xf32>
    %398 = arith.mulf %395, %397 : vector<2x256xf32>
    %399 = arith.addf %389, %398 : vector<2x256xf32>
    %c0_159 = arith.constant 0 : index
    %c100 = arith.constant 100 : index
    %400 = vector.load %arg4[%c0_159, %c100] : memref<2x358xf32, #tpu.memory_space<vmem>>, vector<2x256xf32>
    %c46 = arith.constant 46 : index
    %401 = memref.load %arg2[%c46] : memref<99xf32, #tpu.memory_space<smem>>
    %402 = vector.broadcast %401 : f32 to vector<2x256xf32>
    %403 = arith.mulf %400, %402 : vector<2x256xf32>
    %404 = arith.addf %394, %403 : vector<2x256xf32>
    %c0_160 = arith.constant 0 : index
    %c100_161 = arith.constant 100 : index
    %405 = vector.load %arg5[%c0_160, %c100_161] : memref<2x358xf32, #tpu.memory_space<vmem>>, vector<2x256xf32>
    %c95 = arith.constant 95 : index
    %406 = memref.load %arg2[%c95] : memref<99xf32, #tpu.memory_space<smem>>
    %407 = vector.broadcast %406 : f32 to vector<2x256xf32>
    %408 = arith.mulf %405, %407 : vector<2x256xf32>
    %409 = arith.addf %399, %408 : vector<2x256xf32>
    %410 = arith.addf %404, %409 : vector<2x256xf32>
    %c15_i32 = arith.constant 15 : i32
    %411 = vector.broadcast %c15_i32 : i32 to vector<2x256xi32>
    %412 = arith.cmpi slt, %28, %411 : vector<2x256xi32>
    %cst_162 = arith.constant 0.000000e+00 : f32
    %413 = vector.broadcast %cst_162 : f32 to vector<2x256xf32>
    %414 = arith.select %412, %410, %413 : vector<2x256xi1>, vector<2x256xf32>
    %415 = arith.addf %337, %414 : vector<2x256xf32>
    %cst_163 = arith.constant 0.000000e+00 : f32
    %416 = vector.broadcast %cst_163 : f32 to vector<2x256xf32>
    %cst_164 = arith.constant 0.000000e+00 : f32
    %417 = vector.broadcast %cst_164 : f32 to vector<2x256xf32>
    %c0_165 = arith.constant 0 : index
    %c5 = arith.constant 5 : index
    %418 = vector.load %arg4[%c0_165, %c5] : memref<2x358xf32, #tpu.memory_space<vmem>>, vector<2x256xf32>
    %c5_166 = arith.constant 5 : index
    %419 = memref.load %arg2[%c5_166] : memref<99xf32, #tpu.memory_space<smem>>
    %420 = vector.broadcast %419 : f32 to vector<2x256xf32>
    %421 = arith.mulf %418, %420 : vector<2x256xf32>
    %422 = arith.addf %416, %421 : vector<2x256xf32>
    %c0_167 = arith.constant 0 : index
    %c5_168 = arith.constant 5 : index
    %423 = vector.load %arg5[%c0_167, %c5_168] : memref<2x358xf32, #tpu.memory_space<vmem>>, vector<2x256xf32>
    %c54 = arith.constant 54 : index
    %424 = memref.load %arg2[%c54] : memref<99xf32, #tpu.memory_space<smem>>
    %425 = vector.broadcast %424 : f32 to vector<2x256xf32>
    %426 = arith.mulf %423, %425 : vector<2x256xf32>
    %427 = arith.addf %417, %426 : vector<2x256xf32>
    %c0_169 = arith.constant 0 : index
    %c21_170 = arith.constant 21 : index
    %428 = vector.load %arg4[%c0_169, %c21_170] : memref<2x358xf32, #tpu.memory_space<vmem>>, vector<2x256xf32>
    %c12 = arith.constant 12 : index
    %429 = memref.load %arg2[%c12] : memref<99xf32, #tpu.memory_space<smem>>
    %430 = vector.broadcast %429 : f32 to vector<2x256xf32>
    %431 = arith.mulf %428, %430 : vector<2x256xf32>
    %432 = arith.addf %422, %431 : vector<2x256xf32>
    %c0_171 = arith.constant 0 : index
    %c21_172 = arith.constant 21 : index
    %433 = vector.load %arg5[%c0_171, %c21_172] : memref<2x358xf32, #tpu.memory_space<vmem>>, vector<2x256xf32>
    %c61 = arith.constant 61 : index
    %434 = memref.load %arg2[%c61] : memref<99xf32, #tpu.memory_space<smem>>
    %435 = vector.broadcast %434 : f32 to vector<2x256xf32>
    %436 = arith.mulf %433, %435 : vector<2x256xf32>
    %437 = arith.addf %427, %436 : vector<2x256xf32>
    %c0_173 = arith.constant 0 : index
    %c37_174 = arith.constant 37 : index
    %438 = vector.load %arg4[%c0_173, %c37_174] : memref<2x358xf32, #tpu.memory_space<vmem>>, vector<2x256xf32>
    %c19_175 = arith.constant 19 : index
    %439 = memref.load %arg2[%c19_175] : memref<99xf32, #tpu.memory_space<smem>>
    %440 = vector.broadcast %439 : f32 to vector<2x256xf32>
    %441 = arith.mulf %438, %440 : vector<2x256xf32>
    %442 = arith.addf %432, %441 : vector<2x256xf32>
    %c0_176 = arith.constant 0 : index
    %c37_177 = arith.constant 37 : index
    %443 = vector.load %arg5[%c0_176, %c37_177] : memref<2x358xf32, #tpu.memory_space<vmem>>, vector<2x256xf32>
    %c68_178 = arith.constant 68 : index
    %444 = memref.load %arg2[%c68_178] : memref<99xf32, #tpu.memory_space<smem>>
    %445 = vector.broadcast %444 : f32 to vector<2x256xf32>
    %446 = arith.mulf %443, %445 : vector<2x256xf32>
    %447 = arith.addf %437, %446 : vector<2x256xf32>
    %c0_179 = arith.constant 0 : index
    %c53_180 = arith.constant 53 : index
    %448 = vector.load %arg4[%c0_179, %c53_180] : memref<2x358xf32, #tpu.memory_space<vmem>>, vector<2x256xf32>
    %c26 = arith.constant 26 : index
    %449 = memref.load %arg2[%c26] : memref<99xf32, #tpu.memory_space<smem>>
    %450 = vector.broadcast %449 : f32 to vector<2x256xf32>
    %451 = arith.mulf %448, %450 : vector<2x256xf32>
    %452 = arith.addf %442, %451 : vector<2x256xf32>
    %c0_181 = arith.constant 0 : index
    %c53_182 = arith.constant 53 : index
    %453 = vector.load %arg5[%c0_181, %c53_182] : memref<2x358xf32, #tpu.memory_space<vmem>>, vector<2x256xf32>
    %c75 = arith.constant 75 : index
    %454 = memref.load %arg2[%c75] : memref<99xf32, #tpu.memory_space<smem>>
    %455 = vector.broadcast %454 : f32 to vector<2x256xf32>
    %456 = arith.mulf %453, %455 : vector<2x256xf32>
    %457 = arith.addf %447, %456 : vector<2x256xf32>
    %c0_183 = arith.constant 0 : index
    %c69 = arith.constant 69 : index
    %458 = vector.load %arg4[%c0_183, %c69] : memref<2x358xf32, #tpu.memory_space<vmem>>, vector<2x256xf32>
    %c33_184 = arith.constant 33 : index
    %459 = memref.load %arg2[%c33_184] : memref<99xf32, #tpu.memory_space<smem>>
    %460 = vector.broadcast %459 : f32 to vector<2x256xf32>
    %461 = arith.mulf %458, %460 : vector<2x256xf32>
    %462 = arith.addf %452, %461 : vector<2x256xf32>
    %c0_185 = arith.constant 0 : index
    %c69_186 = arith.constant 69 : index
    %463 = vector.load %arg5[%c0_185, %c69_186] : memref<2x358xf32, #tpu.memory_space<vmem>>, vector<2x256xf32>
    %c82_187 = arith.constant 82 : index
    %464 = memref.load %arg2[%c82_187] : memref<99xf32, #tpu.memory_space<smem>>
    %465 = vector.broadcast %464 : f32 to vector<2x256xf32>
    %466 = arith.mulf %463, %465 : vector<2x256xf32>
    %467 = arith.addf %457, %466 : vector<2x256xf32>
    %c0_188 = arith.constant 0 : index
    %c85_189 = arith.constant 85 : index
    %468 = vector.load %arg4[%c0_188, %c85_189] : memref<2x358xf32, #tpu.memory_space<vmem>>, vector<2x256xf32>
    %c40 = arith.constant 40 : index
    %469 = memref.load %arg2[%c40] : memref<99xf32, #tpu.memory_space<smem>>
    %470 = vector.broadcast %469 : f32 to vector<2x256xf32>
    %471 = arith.mulf %468, %470 : vector<2x256xf32>
    %472 = arith.addf %462, %471 : vector<2x256xf32>
    %c0_190 = arith.constant 0 : index
    %c85_191 = arith.constant 85 : index
    %473 = vector.load %arg5[%c0_190, %c85_191] : memref<2x358xf32, #tpu.memory_space<vmem>>, vector<2x256xf32>
    %c89 = arith.constant 89 : index
    %474 = memref.load %arg2[%c89] : memref<99xf32, #tpu.memory_space<smem>>
    %475 = vector.broadcast %474 : f32 to vector<2x256xf32>
    %476 = arith.mulf %473, %475 : vector<2x256xf32>
    %477 = arith.addf %467, %476 : vector<2x256xf32>
    %c0_192 = arith.constant 0 : index
    %c101 = arith.constant 101 : index
    %478 = vector.load %arg4[%c0_192, %c101] : memref<2x358xf32, #tpu.memory_space<vmem>>, vector<2x256xf32>
    %c47 = arith.constant 47 : index
    %479 = memref.load %arg2[%c47] : memref<99xf32, #tpu.memory_space<smem>>
    %480 = vector.broadcast %479 : f32 to vector<2x256xf32>
    %481 = arith.mulf %478, %480 : vector<2x256xf32>
    %482 = arith.addf %472, %481 : vector<2x256xf32>
    %c0_193 = arith.constant 0 : index
    %c101_194 = arith.constant 101 : index
    %483 = vector.load %arg5[%c0_193, %c101_194] : memref<2x358xf32, #tpu.memory_space<vmem>>, vector<2x256xf32>
    %c96_195 = arith.constant 96 : index
    %484 = memref.load %arg2[%c96_195] : memref<99xf32, #tpu.memory_space<smem>>
    %485 = vector.broadcast %484 : f32 to vector<2x256xf32>
    %486 = arith.mulf %483, %485 : vector<2x256xf32>
    %487 = arith.addf %477, %486 : vector<2x256xf32>
    %488 = arith.addf %482, %487 : vector<2x256xf32>
    %c14_i32 = arith.constant 14 : i32
    %489 = vector.broadcast %c14_i32 : i32 to vector<2x256xi32>
    %490 = arith.cmpi slt, %28, %489 : vector<2x256xi32>
    %cst_196 = arith.constant 0.000000e+00 : f32
    %491 = vector.broadcast %cst_196 : f32 to vector<2x256xf32>
    %492 = arith.select %490, %488, %491 : vector<2x256xi1>, vector<2x256xf32>
    %493 = arith.addf %415, %492 : vector<2x256xf32>
    %cst_197 = arith.constant 0.000000e+00 : f32
    %494 = vector.broadcast %cst_197 : f32 to vector<2x256xf32>
    %cst_198 = arith.constant 0.000000e+00 : f32
    %495 = vector.broadcast %cst_198 : f32 to vector<2x256xf32>
    %c0_199 = arith.constant 0 : index
    %c6 = arith.constant 6 : index
    %496 = vector.load %arg4[%c0_199, %c6] : memref<2x358xf32, #tpu.memory_space<vmem>>, vector<2x256xf32>
    %c6_200 = arith.constant 6 : index
    %497 = memref.load %arg2[%c6_200] : memref<99xf32, #tpu.memory_space<smem>>
    %498 = vector.broadcast %497 : f32 to vector<2x256xf32>
    %499 = arith.mulf %496, %498 : vector<2x256xf32>
    %500 = arith.addf %494, %499 : vector<2x256xf32>
    %c0_201 = arith.constant 0 : index
    %c6_202 = arith.constant 6 : index
    %501 = vector.load %arg5[%c0_201, %c6_202] : memref<2x358xf32, #tpu.memory_space<vmem>>, vector<2x256xf32>
    %c55 = arith.constant 55 : index
    %502 = memref.load %arg2[%c55] : memref<99xf32, #tpu.memory_space<smem>>
    %503 = vector.broadcast %502 : f32 to vector<2x256xf32>
    %504 = arith.mulf %501, %503 : vector<2x256xf32>
    %505 = arith.addf %495, %504 : vector<2x256xf32>
    %c0_203 = arith.constant 0 : index
    %c22_204 = arith.constant 22 : index
    %506 = vector.load %arg4[%c0_203, %c22_204] : memref<2x358xf32, #tpu.memory_space<vmem>>, vector<2x256xf32>
    %c13 = arith.constant 13 : index
    %507 = memref.load %arg2[%c13] : memref<99xf32, #tpu.memory_space<smem>>
    %508 = vector.broadcast %507 : f32 to vector<2x256xf32>
    %509 = arith.mulf %506, %508 : vector<2x256xf32>
    %510 = arith.addf %500, %509 : vector<2x256xf32>
    %c0_205 = arith.constant 0 : index
    %c22_206 = arith.constant 22 : index
    %511 = vector.load %arg5[%c0_205, %c22_206] : memref<2x358xf32, #tpu.memory_space<vmem>>, vector<2x256xf32>
    %c62 = arith.constant 62 : index
    %512 = memref.load %arg2[%c62] : memref<99xf32, #tpu.memory_space<smem>>
    %513 = vector.broadcast %512 : f32 to vector<2x256xf32>
    %514 = arith.mulf %511, %513 : vector<2x256xf32>
    %515 = arith.addf %505, %514 : vector<2x256xf32>
    %c0_207 = arith.constant 0 : index
    %c38_208 = arith.constant 38 : index
    %516 = vector.load %arg4[%c0_207, %c38_208] : memref<2x358xf32, #tpu.memory_space<vmem>>, vector<2x256xf32>
    %c20_209 = arith.constant 20 : index
    %517 = memref.load %arg2[%c20_209] : memref<99xf32, #tpu.memory_space<smem>>
    %518 = vector.broadcast %517 : f32 to vector<2x256xf32>
    %519 = arith.mulf %516, %518 : vector<2x256xf32>
    %520 = arith.addf %510, %519 : vector<2x256xf32>
    %c0_210 = arith.constant 0 : index
    %c38_211 = arith.constant 38 : index
    %521 = vector.load %arg5[%c0_210, %c38_211] : memref<2x358xf32, #tpu.memory_space<vmem>>, vector<2x256xf32>
    %c69_212 = arith.constant 69 : index
    %522 = memref.load %arg2[%c69_212] : memref<99xf32, #tpu.memory_space<smem>>
    %523 = vector.broadcast %522 : f32 to vector<2x256xf32>
    %524 = arith.mulf %521, %523 : vector<2x256xf32>
    %525 = arith.addf %515, %524 : vector<2x256xf32>
    %c0_213 = arith.constant 0 : index
    %c54_214 = arith.constant 54 : index
    %526 = vector.load %arg4[%c0_213, %c54_214] : memref<2x358xf32, #tpu.memory_space<vmem>>, vector<2x256xf32>
    %c27 = arith.constant 27 : index
    %527 = memref.load %arg2[%c27] : memref<99xf32, #tpu.memory_space<smem>>
    %528 = vector.broadcast %527 : f32 to vector<2x256xf32>
    %529 = arith.mulf %526, %528 : vector<2x256xf32>
    %530 = arith.addf %520, %529 : vector<2x256xf32>
    %c0_215 = arith.constant 0 : index
    %c54_216 = arith.constant 54 : index
    %531 = vector.load %arg5[%c0_215, %c54_216] : memref<2x358xf32, #tpu.memory_space<vmem>>, vector<2x256xf32>
    %c76 = arith.constant 76 : index
    %532 = memref.load %arg2[%c76] : memref<99xf32, #tpu.memory_space<smem>>
    %533 = vector.broadcast %532 : f32 to vector<2x256xf32>
    %534 = arith.mulf %531, %533 : vector<2x256xf32>
    %535 = arith.addf %525, %534 : vector<2x256xf32>
    %c0_217 = arith.constant 0 : index
    %c70_218 = arith.constant 70 : index
    %536 = vector.load %arg4[%c0_217, %c70_218] : memref<2x358xf32, #tpu.memory_space<vmem>>, vector<2x256xf32>
    %c34_219 = arith.constant 34 : index
    %537 = memref.load %arg2[%c34_219] : memref<99xf32, #tpu.memory_space<smem>>
    %538 = vector.broadcast %537 : f32 to vector<2x256xf32>
    %539 = arith.mulf %536, %538 : vector<2x256xf32>
    %540 = arith.addf %530, %539 : vector<2x256xf32>
    %c0_220 = arith.constant 0 : index
    %c70_221 = arith.constant 70 : index
    %541 = vector.load %arg5[%c0_220, %c70_221] : memref<2x358xf32, #tpu.memory_space<vmem>>, vector<2x256xf32>
    %c83_222 = arith.constant 83 : index
    %542 = memref.load %arg2[%c83_222] : memref<99xf32, #tpu.memory_space<smem>>
    %543 = vector.broadcast %542 : f32 to vector<2x256xf32>
    %544 = arith.mulf %541, %543 : vector<2x256xf32>
    %545 = arith.addf %535, %544 : vector<2x256xf32>
    %c0_223 = arith.constant 0 : index
    %c86_224 = arith.constant 86 : index
    %546 = vector.load %arg4[%c0_223, %c86_224] : memref<2x358xf32, #tpu.memory_space<vmem>>, vector<2x256xf32>
    %c41 = arith.constant 41 : index
    %547 = memref.load %arg2[%c41] : memref<99xf32, #tpu.memory_space<smem>>
    %548 = vector.broadcast %547 : f32 to vector<2x256xf32>
    %549 = arith.mulf %546, %548 : vector<2x256xf32>
    %550 = arith.addf %540, %549 : vector<2x256xf32>
    %c0_225 = arith.constant 0 : index
    %c86_226 = arith.constant 86 : index
    %551 = vector.load %arg5[%c0_225, %c86_226] : memref<2x358xf32, #tpu.memory_space<vmem>>, vector<2x256xf32>
    %c90 = arith.constant 90 : index
    %552 = memref.load %arg2[%c90] : memref<99xf32, #tpu.memory_space<smem>>
    %553 = vector.broadcast %552 : f32 to vector<2x256xf32>
    %554 = arith.mulf %551, %553 : vector<2x256xf32>
    %555 = arith.addf %545, %554 : vector<2x256xf32>
    %c0_227 = arith.constant 0 : index
    %c102 = arith.constant 102 : index
    %556 = vector.load %arg4[%c0_227, %c102] : memref<2x358xf32, #tpu.memory_space<vmem>>, vector<2x256xf32>
    %c48_228 = arith.constant 48 : index
    %557 = memref.load %arg2[%c48_228] : memref<99xf32, #tpu.memory_space<smem>>
    %558 = vector.broadcast %557 : f32 to vector<2x256xf32>
    %559 = arith.mulf %556, %558 : vector<2x256xf32>
    %560 = arith.addf %550, %559 : vector<2x256xf32>
    %c0_229 = arith.constant 0 : index
    %c102_230 = arith.constant 102 : index
    %561 = vector.load %arg5[%c0_229, %c102_230] : memref<2x358xf32, #tpu.memory_space<vmem>>, vector<2x256xf32>
    %c97_231 = arith.constant 97 : index
    %562 = memref.load %arg2[%c97_231] : memref<99xf32, #tpu.memory_space<smem>>
    %563 = vector.broadcast %562 : f32 to vector<2x256xf32>
    %564 = arith.mulf %561, %563 : vector<2x256xf32>
    %565 = arith.addf %555, %564 : vector<2x256xf32>
    %566 = arith.addf %560, %565 : vector<2x256xf32>
    %c13_i32 = arith.constant 13 : i32
    %567 = vector.broadcast %c13_i32 : i32 to vector<2x256xi32>
    %568 = arith.cmpi slt, %28, %567 : vector<2x256xi32>
    %cst_232 = arith.constant 0.000000e+00 : f32
    %569 = vector.broadcast %cst_232 : f32 to vector<2x256xf32>
    %570 = arith.select %568, %566, %569 : vector<2x256xi1>, vector<2x256xf32>
    %571 = arith.addf %493, %570 : vector<2x256xf32>
    %c98_233 = arith.constant 98 : index
    %572 = memref.load %arg2[%c98_233] : memref<99xf32, #tpu.memory_space<smem>>
    %573 = vector.broadcast %572 : f32 to vector<2x256xf32>
    %574 = arith.addf %571, %573 : vector<2x256xf32>
    %575 = arith.negf %574 : vector<2x256xf32>
    %576 = math.exp %575 : vector<2x256xf32>
    %cst_234 = arith.constant 1.000000e+00 : f32
    %577 = vector.broadcast %cst_234 : f32 to vector<2x256xf32>
    %578 = arith.addf %577, %576 : vector<2x256xf32>
    %579 = arith.divf %577, %578 : vector<2x256xf32>
    %c0_235 = arith.constant 0 : index
    %c0_236 = arith.constant 0 : index
    %c0_237 = arith.constant 0 : index
    %580 = vector.load %arg1[%c0_235, %c0_236, %c0_237] : memref<2x4x256xf32, #tpu.memory_space<vmem>>, vector<2x4x256xf32>
    %581 = vector.shape_cast %579 : vector<2x256xf32> to vector<2x1x256xf32>
    %582 = vector.broadcast %581 : vector<2x1x256xf32> to vector<2x4x256xf32>
    %583 = arith.mulf %580, %582 : vector<2x4x256xf32>
    %c0_238 = arith.constant 0 : index
    %c0_239 = arith.constant 0 : index
    %c0_240 = arith.constant 0 : index
    %584 = vector.load %arg3[%c0_238, %c0_239, %c0_240] : memref<2x4x256xf32, #tpu.memory_space<vmem>>, vector<2x4x256xf32>
    tpu.vector_store %arg3[%c0_238, %c0_239, %c0_240], %583 {strides = array<i32>} : memref<2x4x256xf32, #tpu.memory_space<vmem>>, vector<2x4x256xf32>,
    return
  }
  func.func @transform_0(%arg0: i32) -> (i32, i32, i32) {
    %c0_i32 = arith.constant 0 : i32
    %c0_i32_0 = arith.constant 0 : i32
    %c0_i32_1 = arith.constant 0 : i32
    return %arg0, %c0_i32, %c0_i32_0 : i32, i32, i32
  }
  func.func @transform_1(%arg0: i32) -> i32 {
    %c0_i32 = arith.constant 0 : i32
    %c0_i32_0 = arith.constant 0 : i32
    return %c0_i32 : i32
  }
  func.func @transform_2(%arg0: i32) -> (i32, i32, i32) {
    %c0_i32 = arith.constant 0 : i32
    %c0_i32_0 = arith.constant 0 : i32
    %c0_i32_1 = arith.constant 0 : i32
    return %arg0, %c0_i32, %c0_i32_0 : i32, i32, i32
  }
}

</mosaic_0001>

<bundles_post_ra>
// kernel: tpu_custom_call.1
= control target key start
LH: loop header
LB: loop body
LE: loop exit
PB: predicated region body
PF: predicated region fallthrough
CT: control target
= control target key end

     0   :  { %7 = vsyncpa [#allocation5], 0  ;;  %s2121_s0 = inlined_call_operand.hbm [shape: f32[2,4,256], index: 0, kind: input, shape index: {}]   ;;  %s2122_s1 = inlined_call_operand.hbm [shape: f32[99], index: 1, kind: input, shape index: {}]   ;;  %s2123_s2 = inlined_call_operand.hbm [shape: f32[2,4,256], index: 2, kind: output, shape index: {}]  }
   0x1   :  { %8 = vsyncpa [#allocation7], 0 }
   0x2   :  { %9 = vsyncpa [#allocation6], 0  ;;  %s14_s11 = sshll.u32 %s2121_s0, 4  ;;  %s1559_s12 = smov [#allocation4]   ;;  %s15_s11 = int_to_ptr.hbm [resolvable:$true] %s14_s11 }
   0x3   :  { %s16_s13 = sshll.u32 %s1559_s12, 4  ;;  %s28_s16 = sshll.u32 %s2122_s1, 4  ;;  %s17_s13 = int_to_ptr.vmem [resolvable:$true] %s16_s13  ;;  %s29_s16 = int_to_ptr.hbm [resolvable:$true] %s28_s16 }
   0x4   :  { %s1560_s17 = smov 128   ;;  %s1561_s18 = smov 8  }
   0x5   :  { %22 = dma.hbm_to_vmem [thread:$0]  %s15_s11, 256, %s17_s13, [#allocation5], %s1560_s17, %s1560_s17, %s1561_s18  }
   0x6   :  { %s1562_s19 = smov [#allocation8]  }
   0x7   :  { %31 = dma.hbm_to_smem %s29_s16, 16, %s1562_s19, [#allocation7]  }
   0x8   :  { %1553 = dma.done.wait [#allocation5], 256  }
   0x9   :  { %1554 = vsyncadd [#allocation5], 4294967040 }
   0xa   :  { %1555 = dma.done.wait [#allocation7], 16  }
   0xb   :  { %1556 = vsyncadd [#allocation7], 4294967280 }
   0xc   :  { %40 = sfence }
   0xd   :  { %v41_v0 = vld [vmem:[#allocation4] sm:$0xff]  ;;  %v42_v1 = vld [vmem:[#allocation4 + $0x8] sm:$0xff]  ;;  %vm56_vm0 = vcmask 1043456   ;;  %vm128_vm1 = vcmask 410624   ;;  %vm130_vm2 = vcmask 828824   ;;  %v1563_v18 = vmov 0.0  }
   0xe   :  { %45 = vst [vmem:[#allocation1] ss:$2 sm:$0xff] %v41_v0  ;;  %vm140_vm3 = vcmask 1041408   ;;  %vm148_vm4 = vcmask 1041409   ;;  %vm150_vm5 = vcmask 1043459   ;;  %vm152_vm6 = vcmask 1045509  }
   0xf   :  { %49 = vst [vmem:[#allocation1 + $0x10] ss:$2 sm:$0xff] %v42_v1  ;;  %vm154_vm7 = vcmask 1047559   ;;  %s1564_s0 = smov 51   ;;  %vm162_vm8 = vcmask 1041816   ;;  %vm163_vm9 = vcmask 1043458  }
  0x10   :  { %129 = vst.msk [vmem:[#allocation2] sm:$0x3] %vm128_vm1, %v1563_v18  ;;  %vm164_vm10 = vmor %vm163_vm9, %vm162_vm8  ;;  %vm165_vm11 = vcmask 414724   ;;  %s1371_s1 = sld [smem:[#allocation8 + $0x15]]  ;;  %vm159_vm12 = vcmask 416768   ;;  %s1565_s25 = smov 80  }
  0x11   :  { %131 = vst.msk [vmem:[#allocation2 + $0x4] sm:$0x3] %vm130_vm2, %v1563_v18  ;;  %s1369_s20 = sld [smem:[#allocation8 + $0xe]]  ;;  %vm1622_vm13 = vmor %vm165_vm11, %vm164_vm10  ;;  %s1566_s26 = smov 96   ;;  %vm234_vm14 = vcmask 916480   ;;  %vm256_vm15 = vcmask 785408  }
  0x12   :  { %132 = vst.msk [vmem:[#allocation3] sm:$0x3] %vm128_vm1, %v1563_v18  ;;  %s1367_s21 = sld [smem:[#allocation8 + $0x7]]  ;;  %s1567_s27 = smov 112   ;;  %vm277_vm1 = vcmask 654336  }
  0x13   :  { %133 = vst.msk [vmem:[#allocation3 + $0x4] sm:$0x3] %vm130_vm2, %v1563_v18  ;;  %s1377_s22 = sld [smem:[#allocation8 + $0x2a]]  ;;  %s1568_s3 = smov 32   ;;  %vm298_vm2 = vcmask 523264  }
  0x14   :  { %s1373_s23 = sld [smem:[#allocation8 + $0x1c]]  ;;  %s1569_s4 = smov 64  }
  0x15   :  { %v46_v2 = vld.sshfl [vmem:[#allocation1] sm:$0xff pattern:$0x75316420]  ;;  %v47_v3 = vld.sshfl [vmem:[#allocation1 + $0x8] sm:$0xff pattern:$0x75316420] }
  0x16   :  { %v50_v4 = vld.sshfl [vmem:[#allocation1 + $0x10] sm:$0xff pattern:$0x75316420]  ;;  %v51_v5 = vld.sshfl [vmem:[#allocation1 + $0x18] sm:$0xff pattern:$0x75316420] }
  0x17   :  { %v57_v6 = vsel %vm56_vm0, %v46_v2, 0.0  ;;  %v64_v7 = vsel %vm56_vm0, %v47_v3, 0.0  ;;  %v71_v8 = vsel %vm56_vm0, %v50_v4, 0.0  ;;  %v78_v9 = vsel %vm56_vm0, %v51_v5, 0.0  ;;  %89 = vst [vmem:[#allocation1] ss:$2 sm:$0xff] %v41_v0 }
  0x18   :  { %v58_v10 = vrot.slane %v57_v6, 4  ;;  %v65_v11 = vrot.slane %v64_v7, 4  ;;  %v72_v12 = vrot.slane %v71_v8, 4  ;;  %v79_v13 = vrot.slane %v78_v9, 4  ;;  %93 = vst [vmem:[#allocation1 + $0x10] ss:$2 sm:$0xff] %v42_v1 }
  0x19   :  { %s1375_s24 = sld [smem:[#allocation8 + $0x23]]  ;;  %s1570_s5 = smov 48  }
  0x1a   :  { %v59_v14 = vadd.f32 %v58_v10, %v57_v6  ;;  %v66_v15 = vadd.f32 %v65_v11, %v64_v7  ;;  %v73_v16 = vadd.f32 %v72_v12, %v71_v8  ;;  %v80_v17 = vadd.f32 %v79_v13, %v78_v9  ;;  %s1385_s28 = sld [smem:[#allocation8 + $0x16]] }
  0x1b   :  { %s1381_s29 = sld [smem:[#allocation8 + $0x8]] }
  0x1c   :  { %v60_v19 = vrot.slane %v59_v14, 2  ;;  %v67_v20 = vrot.slane %v66_v15, 2  ;;  %v74_v21 = vrot.slane %v73_v16, 2  ;;  %v81_v22 = vrot.slane %v80_v17, 2  ;;  %s1383_s30 = sld [smem:[#allocation8 + $0xf]] }
  0x1d   :  { %s1391_s6 = sld [smem:[#allocation8 + $0x2b]] }
  0x1e   :  { %v61_v23 = vadd.f32 %v60_v19, %v59_v14  ;;  %v68_v24 = vadd.f32 %v67_v20, %v66_v15  ;;  %v75_v25 = vadd.f32 %v74_v21, %v73_v16  ;;  %v82_v26 = vadd.f32 %v81_v22, %v80_v17  ;;  %v90_v27 = vld.sshfl [vmem:[#allocation1] sm:$0xff pattern:$0x75316420]  ;;  %v91_v28 = vld.sshfl [vmem:[#allocation1 + $0x8] sm:$0xff pattern:$0x75316420] }
  0x1f   :  { %v94_v29 = vld.sshfl [vmem:[#allocation1 + $0x10] sm:$0xff pattern:$0x75316420]  ;;  %v95_v30 = vld.sshfl [vmem:[#allocation1 + $0x18] sm:$0xff pattern:$0x75316420] }
  0x20   :  { %v62_v31 = vrot.slane %v61_v23, 1  ;;  %v69_v32 = vrot.slane %v68_v24, 1  ;;  %v76_v33 = vrot.slane %v75_v25, 1  ;;  %v83_v34 = vrot.slane %v82_v26, 1  ;;  %s1387_s7 = sld [smem:[#allocation8 + $0x1d]] }
  0x21   :  { %v100_v35 = vsel %vm56_vm0, %v90_v27, -inf  ;;  %v107_v36 = vsel %vm56_vm0, %v91_v28, -inf  ;;  %v114_v37 = vsel %vm56_vm0, %v94_v29, -inf  ;;  %v121_v38 = vsel %vm56_vm0, %v95_v30, -inf  ;;  %s1389_s8 = sld [smem:[#allocation8 + $0x24]] }
  0x22   :  { %v63_v39 = vadd.f32 %v62_v31, %v61_v23  ;;  %v70_v40 = vadd.f32 %v69_v32, %v68_v24  ;;  %v77_v41 = vadd.f32 %v76_v33, %v75_v25  ;;  %v84_v42 = vadd.f32 %v83_v34, %v82_v26  ;;  %s1399_s9 = sld [smem:[#allocation8 + $0x17]] }
  0x23   :  { %v101_v43 = vrot.slane %v100_v35, 4  ;;  %v108_v44 = vrot.slane %v107_v36, 4  ;;  %v115_v45 = vrot.slane %v114_v37, 4  ;;  %v122_v46 = vrot.slane %v121_v38, 4  ;;  %s1395_s10 = sld [smem:[#allocation8 + $0x9]] }
  0x24   :  { %v85_v47 = vmul.f32 0.25, %v63_v39  ;;  %v86_v48 = vmul.f32 0.25, %v70_v40  ;;  %v87_v49 = vmul.f32 0.25, %v77_v41  ;;  %v88_v50 = vmul.f32 0.25, %v84_v42  ;;  %s1397_s11 = sld [smem:[#allocation8 + $0x10]] }
  0x25   :  { %v102_v51 = vmax.f32 %v100_v35, %v101_v43  ;;  %v109_v52 = vmax.f32 %v107_v36, %v108_v44  ;;  %v116_v53 = vmax.f32 %v114_v37, %v115_v45  ;;  %v123_v54 = vmax.f32 %v121_v38, %v122_v46  ;;  %s1405_s12 = sld [smem:[#allocation8 + $0x2c]] }
  0x26   :  { %v138_v55 = vrot.slane %v86_v48, 6  ;;  %v139_v56 = vrot.slane %v88_v50, 6  ;;  %v271_v29 = vstv %s1371_s1  ;;  %v250_v30 = vstv %s1369_s20  ;;  %s1401_s13 = sld [smem:[#allocation8 + $0x1e]] }
  0x27   :  { %v103_v57 = vrot.slane %v102_v51, 2  ;;  %v110_v58 = vrot.slane %v109_v52, 2  ;;  %v117_v59 = vrot.slane %v116_v53, 2  ;;  %v124_v60 = vrot.slane %v123_v54, 2  ;;  %s1403_s14 = sld [smem:[#allocation8 + $0x25]] }
  0x28   :  { %v141_v61 = vsel %vm140_vm3, %v85_v47, %v138_v55  ;;  %v142_v62 = vsel %vm140_vm3, %v87_v49, %v139_v56  ;;  %v228_v31 = vstv %s1367_s21  ;;  %v334_v36 = vstv %s1377_s22  ;;  %s1413_s15 = sld [smem:[#allocation8 + $0x18]] }
  0x29   :  { %v147_v63 = vrot.slane %v142_v62, 7  ;;  %v104_v0 = vmax.f32 %v102_v51, %v103_v57  ;;  %v111_v1 = vmax.f32 %v109_v52, %v110_v58  ;;  %v118_v2 = vmax.f32 %v116_v53, %v117_v59  ;;  %s1409_s16 = sld [smem:[#allocation8 + $0xa]] }
  0x2a   :  { %v125_v3 = vmax.f32 %v123_v54, %v124_v60  ;;  %v292_v37 = vstv %s1373_s23  ;;  %v313_v38 = vstv %s1375_s24  ;;  %v418_v43 = vstv %s1385_s28  ;;  %s1411_s19 = sld [smem:[#allocation8 + $0x11]] }
  0x2b   :  { %v149_v4 = vsel %vm148_vm4, %v147_v63, %v141_v61  ;;  %v105_v5 = vrot.slane %v104_v0, 1  ;;  %v112_v6 = vrot.slane %v111_v1, 1  ;;  %v119_v7 = vrot.slane %v118_v2, 1  ;;  %s1415_s1 = sld [smem:[#allocation8 + $0x1f]] }
  0x2c   :  { %v151_v8 = vsel %vm150_vm5, %v147_v63, %v149_v4  ;;  %v126_v9 = vrot.slane %v125_v3, 1  ;;  %v378_v44 = vstv %s1381_s29  ;;  %v398_v45 = vstv %s1383_s30  ;;  %s1417_s20 = sld [smem:[#allocation8 + $0x26]] }
  0x2d   :  { %v153_v10 = vsel %vm152_vm6, %v147_v63, %v151_v8  ;;  %v113_v11 = vmax.f32 %v111_v1, %v112_v6  ;;  %v106_v13 = vmax.f32 %v104_v0, %v105_v5  ;;  %v120_v14 = vmax.f32 %v118_v2, %v119_v7  ;;  %s1427_s21 = sld [smem:[#allocation8 + $0x19]] }
  0x2e   :  { %v155_v12 = vsel %vm154_vm7, %v147_v63, %v153_v10  ;;  %v127_v15 = vmax.f32 %v125_v3, %v126_v9  ;;  %v478_v49 = vstv %s1391_s6  ;;  %v438_v50 = vstv %s1387_s7  ;;  %s1419_s22 = sld [smem:[#allocation8 + $0x2d]] }
  0x2f   :  { %156 = vrot.lane.b32.xlu0 %v155_v12, %s1564_s0  ;;  %v172_v16 = vrot.slane %v113_v11, 6  ;;  %v458_v51 = vstv %s1389_s8  ;;  %v571_v56 = vstv %s1399_s9  ;;  %v531_v57 = vstv %s1395_s10  ;;  %s1425_s23 = sld [smem:[#allocation8 + $0x12]] }
  0x30   :  { %v173_v17 = vrot.slane %v127_v15, 6  ;;  %v551_v58 = vstv %s1397_s11  ;;  %v631_v0 = vstv %s1405_s12  ;;  %v591_v1 = vstv %s1401_s13  ;;  %s1437_s24 = sld [smem:[#allocation8 + $0xc]] }
  0x31   :  { %v174_v18 = vsel %vm140_vm3, %v106_v13, %v172_v16  ;;  %v611_v2 = vstv %s1403_s14  ;;  %v724_v8 = vstv %s1413_s15  ;;  %v684_v9 = vstv %s1409_s16  ;;  %s1429_s28 = sld [smem:[#allocation8 + $0x20]] }
  0x32   :  { %v175_v19 = vsel %vm140_vm3, %v120_v14, %v173_v17  ;;  %v704_v10 = vstv %s1411_s19  ;;  %v744_v16 = vstv %s1415_s1  ;;  %v764_v17 = vstv %s1417_s20  ;;  %s1431_s29 = sld [smem:[#allocation8 + $0x27]] }
  0x33   :  { %v178_v20 = vrot.slane %v175_v19, 7  ;;  %s1433_s30 = sld [smem:[#allocation8 + $0x2e]]  ;;  %vm319_vm3 = vcmask 392192  }
  0x34   :  { %s1374_s6 = sld [smem:[#allocation8 + $0x4d]] }
  0x35   :  { %v179_v21 = vsel %vm148_vm4, %v178_v20, %v174_v18  ;;  %s1368_s7 = sld [smem:[#allocation8 + $0x38]] }
  0x36   :  { %v180_v22 = vsel %vm150_vm5, %v178_v20, %v179_v21  ;;  %v873_v21 = vstv %s1427_s21  ;;  %s1382_s8 = sld [smem:[#allocation8 + $0x39]]  ;;  %vm340_vm5 = vcmask 261120  }
  0x37   :  { %v181_v23 = vsel %vm152_vm6, %v178_v20, %v180_v22  ;;  %v784_v22 = vstv %s1419_s22  ;;  %s1370_s9 = sld [smem:[#allocation8 + $0x3f]]  ;;  %vm511_vm6 = vcmask 1039360  }
  0x38   :  { %v182_v24 = vsel %vm154_vm7, %v178_v20, %v181_v23  ;;  %v853_v23 = vstv %s1425_s23  ;;  %s1372_s10 = sld [smem:[#allocation8 + $0x46]]  ;;  %vm664_vm7 = vcmask 1031168  }
  0x39   :  { %183 = vrot.lane.b32.xlu0 %v182_v24, %s1564_s0  ;;  %s1423_s0 = sld [smem:[#allocation8 + $0xb]] }
  0x3a   :  { %s1388_s11 = sld [smem:[#allocation8 + $0x4e]] }
  0x3b   :  { %s1376_s12 = sld [smem:[#allocation8 + $0x54]] }
  0x3c   :  { %s1378_s13 = sld [smem:[#allocation8 + $0x5b]] }
  0x3d   :  { %s1396_s14 = sld [smem:[#allocation8 + $0x3a]] }
  0x3e   :  { %s1384_s15 = sld [smem:[#allocation8 + $0x40]] }
  0x3f   :  { %v833_v15 = vstv %s1423_s0  ;;  %s1386_s16 = sld [smem:[#allocation8 + $0x47]] }
  0x40   :  { %s1379_s19 = sld [smem:[#allocation8 + $0x1]] }
  0x41   :  { %s1402_s0 = sld [smem:[#allocation8 + $0x4f]] }
  0x42   :  { %s1390_s1 = sld [smem:[#allocation8 + $0x55]] }
  0x43   :  { %s1392_s20 = sld [smem:[#allocation8 + $0x5c]] }
  0x44   :  { %s1722_s21 = sld [smem:[#allocation8]] }
  0x45   :  { %s1724_s22 = sld [smem:[#allocation8 + $0x3b]] }
  0x46   :  { %s1726_s23 = sld [smem:[#allocation8 + $0x41]] }
  0xa1   :  { %v157_v25 = vpop.permute.xlu0 %156 }
  0xa2   :  { %v158_v27 = vrot.slane %v157_v25, 6 }
  0xa4   :  { %v160_v28 = vsel %vm159_vm12, %v158_v27, %v157_v25 }
  0xa5   :  { %167 = vst.msk [vmem:[#allocation2] sm:$0x3f] %vm1622_vm13, %v160_v28  ;;  %v986_v28 = vstv %s1437_s24  ;;  %s1729_s24 = sld [smem:[#allocation8 + $0x48]] }
  0xab   :  { %v184_v62 = vpop.permute.xlu0 %183 }
  0xac   :  { %v226_v32 = vld [vmem:[#allocation2] sm:$0x3f]  ;;  %v185_v63 = vrot.slane %v184_v62, 6 }
  0xad   :  { %v272_v33 = vmul.f32 %v271_v29, %v226_v32  ;;  %v251_v34 = vmul.f32 %v250_v30, %v226_v32  ;;  %v229_v35 = vmul.f32 %v228_v31, %v226_v32  ;;  %v335_v39 = vmul.f32 %v334_v36, %v226_v32  ;;  %v1635_v42 = vld [vmem:[#allocation2] sm:$0x3f] }
  0xae   :  { %v293_v40 = vmul.f32 %v292_v37, %v226_v32  ;;  %v314_v41 = vmul.f32 %v313_v38, %v226_v32  ;;  %v419_v46 = vmul.f32 %v418_v43, %v1635_v42  ;;  %v379_v47 = vmul.f32 %v378_v44, %v1635_v42  ;;  %v1649_v55 = vld [vmem:[#allocation2] sm:$0x3f] }
  0xaf   :  { %274 = vrot.lane.b32.xlu0 %v272_v33, %s1565_s25  ;;  %253 = vrot.lane.b32.xlu2 %v251_v34, %s1566_s26  ;;  %v399_v48 = vmul.f32 %v398_v45, %v1635_v42  ;;  %v479_v52 = vmul.f32 %v478_v49, %v1635_v42  ;;  %v439_v53 = vmul.f32 %v438_v50, %v1635_v42  ;;  %v1666_v7 = vld [vmem:[#allocation2] sm:$0x3f]  ;;  %v893_v29 = vstv %s1429_s28  ;;  %s1737_s28 = sld [smem:[#allocation8 + $0x2]] }
  0xb0   :  { %231 = vrot.lane.b32.xlu1 %v229_v35, %s1567_s27  ;;  %v459_v54 = vmul.f32 %v458_v51, %v1635_v42  ;;  %v572_v59 = vmul.f32 %v571_v56, %v1649_v55  ;;  %v532_v60 = vmul.f32 %v531_v57, %v1649_v55  ;;  %v552_v61 = vmul.f32 %v551_v58, %v1649_v55  ;;  %v1674_v14 = vld [vmem:[#allocation2] sm:$0x3f] }
  0xb1   :  { %v186_v3 = vsel %vm159_vm12, %v185_v63, %v184_v62  ;;  %v632_v4 = vmul.f32 %v631_v0, %v1649_v55  ;;  %v592_v5 = vmul.f32 %v591_v1, %v1649_v55  ;;  %v612_v6 = vmul.f32 %v611_v2, %v1649_v55  ;;  %v1688_v27 = vld [vmem:[#allocation2] sm:$0x3f] }
  0xb2   :  { %188 = vst.msk [vmem:[#allocation3] sm:$0x3f] %vm1622_vm13, %v186_v3  ;;  %v725_v11 = vmul.f32 %v724_v8, %v1666_v7  ;;  %v685_v12 = vmul.f32 %v684_v9, %v1666_v7  ;;  %v705_v13 = vmul.f32 %v704_v10, %v1666_v7  ;;  %v834_v18 = vmul.f32 %v833_v15, %v1674_v14 }
  0xb3   :  { %v745_v19 = vmul.f32 %v744_v16, %v1666_v7  ;;  %v765_v20 = vmul.f32 %v764_v17, %v1666_v7  ;;  %v874_v24 = vmul.f32 %v873_v21, %v1674_v14  ;;  %v785_v25 = vmul.f32 %v784_v22, %v1666_v7  ;;  %v216_v16 = vld [vmem:[#allocation2] sm:$0xf] }
  0xb4   :  { %v854_v26 = vmul.f32 %v853_v23, %v1674_v14  ;;  %v913_v30 = vstv %s1431_s29  ;;  %v987_v31 = vmul.f32 %v986_v28, %v1688_v27  ;;  %v894_v32 = vmul.f32 %v893_v29, %v1674_v14  ;;  %s1745_s29 = sld [smem:[#allocation8 + $0x50]] }
  0xb5   :  { %v914_v33 = vmul.f32 %v913_v30, %v1674_v14  ;;  %v933_v34 = vstv %s1433_s30  ;;  %v303_v36 = vstv %s1374_s6  ;;  %v240_v37 = vstv %s1368_s7  ;;  %s1751_s30 = sld [smem:[#allocation8 + $0x56]] }
  0xb6   :  { %v934_v38 = vmul.f32 %v933_v34, %v1674_v14  ;;  %v388_v43 = vstv %s1382_s8  ;;  %v261_v44 = vstv %s1370_s9  ;;  %v282_v45 = vstv %s1372_s10  ;;  %s1755_s6 = sld [smem:[#allocation8 + $0x5d]] }
  0xb7   :  { %337 = vrot.lane.b32.xlu0 %v335_v39, %s1568_s3  ;;  %295 = vrot.lane.b32.xlu2 %v293_v40, %s1569_s4  ;;  %v448_v50 = vstv %s1388_s11  ;;  %v324_v51 = vstv %s1376_s12  ;;  %s1771_s7 = sld [smem:[#allocation8 + $0x5e]] }
  0xb8   :  { %316 = vrot.lane.b32.xlu1 %v314_v41, %s1570_s5  ;;  %v369_v1 = vstv %s1379_s19  ;;  %v488_v8 = vstv %s1392_s20  ;;  %v218_v15 = vstv %s1722_s21  ;;  %s1774_s8 = sld [smem:[#allocation8 + $0x42]] }
  0xb9   :  { %v238_v35 = vld [vmem:[#allocation3] sm:$0x3f]  ;;  %v561_v21 = vstv %s1726_s23  ;;  %s1779_s9 = sld [smem:[#allocation8 + $0x49]] }
  0xba   :  { %v304_v39 = vmul.f32 %v303_v36, %v238_v35  ;;  %v241_v40 = vmul.f32 %v240_v37, %v238_v35  ;;  %v1700_v41 = vld [vmem:[#allocation3] sm:$0x3f]  ;;  %s1794_s10 = sld [smem:[#allocation8 + $0x3]] }
  0xbb   :  { %v1714_v58 = vld [vmem:[#allocation3] sm:$0x3f]  ;;  %s1798_s11 = sld [smem:[#allocation8 + $0x51]] }
  0xbc   :  { %v562_v30 = vmul.f32 %v561_v21, %v1714_v58  ;;  %s1802_s12 = sld [smem:[#allocation8 + $0x57]] }
  0xbd   :  { %s1845_s19 = sld [smem:[#allocation8 + $0x1a]] }
  0xbe   :  { %s1865_s20 = sld [smem:[#allocation8 + $0x52]] }
  0xbf   :  { %421 = vrot.lane.b32.xlu0 %v419_v46, %s1565_s25  ;;  %381 = vrot.lane.b32.xlu2 %v379_v47, %s1567_s27  ;;  %v389_v46 = vmul.f32 %v388_v43, %v1700_v41  ;;  %v262_v47 = vmul.f32 %v261_v44, %v238_v35  ;;  %v754_v43 = vstv %s1745_s29  ;;  %s1869_s21 = sld [smem:[#allocation8 + $0x44]] }
  0xc0   :  { %401 = vrot.lane.b32.xlu1 %v399_v48, %s1566_s26  ;;  %v283_v48 = vmul.f32 %v282_v45, %v238_v35  ;;  %s1883_s23 = sld [smem:[#allocation8 + $0x4]] }
  0xc1   :  { %s1893_s29 = sld [smem:[#allocation8 + $0x4b]] }
  0xc7   :  { %481 = vrot.lane.b32.xlu0 %v479_v52, %s1568_s3  ;;  %441 = vrot.lane.b32.xlu2 %v439_v53, %s1569_s4  ;;  %v345_v52 = vstv %s1378_s13  ;;  %v449_v53 = vmul.f32 %v448_v50, %v1700_v41  ;;  %s1805_s13 = sld [smem:[#allocation8 + $0x3c]] }
  0xc8   :  { %461 = vrot.lane.b32.xlu1 %v459_v54, %s1570_s5  ;;  %v325_v54 = vmul.f32 %v324_v51, %v238_v35  ;;  %v346_v56 = vmul.f32 %v345_v52, %v238_v35  ;;  %v641_v51 = vstv %s1755_s6  ;;  %s1916_s6 = sld [smem:[#allocation8 + $0x59]] }
  0xcf   :  { %574 = vrot.lane.b32.xlu0 %v572_v59, %s1565_s25  ;;  %534 = vrot.lane.b32.xlu2 %v532_v60, %s1567_s27  ;;  %v541_v59 = vstv %s1396_s14  ;;  %v408_v60 = vstv %s1384_s15  ;;  %s1820_s14 = sld [smem:[#allocation8 + $0x5f]] }
  0xd0   :  { %554 = vrot.lane.b32.xlu1 %v552_v61, %s1566_s26  ;;  %v428_v61 = vstv %s1386_s16  ;;  %v542_v62 = vmul.f32 %v541_v59, %v1714_v58  ;;  %v409_v63 = vmul.f32 %v408_v60, %v1700_v41  ;;  %v642_v60 = vmul.f32 %v641_v51, %v1714_v58  ;;  %s1826_s15 = sld [smem:[#allocation8 + $0x43]] }
  0xd1   :  { %v429_v0 = vmul.f32 %v428_v61, %v1700_v41  ;;  %s1428_s16 = sld [smem:[#allocation8 + $0x4a]] }
  0xd7   :  { %634 = vrot.lane.b32.xlu0 %v632_v4, %s1568_s3  ;;  %594 = vrot.lane.b32.xlu2 %v592_v5, %s1569_s4  ;;  %v601_v4 = vstv %s1402_s0  ;;  %v468_v5 = vstv %s1390_s1  ;;  %s1849_s0 = sld [smem:[#allocation8 + $0x58]] }
  0xd8   :  { %614 = vrot.lane.b32.xlu1 %v612_v6, %s1570_s5  ;;  %v370_v6 = vmul.f32 %v369_v1, %v1635_v42  ;;  %s1438_s1 = sld [smem:[#allocation8 + $0x3d]] }
  0xdf   :  { %727 = vrot.lane.b32.xlu0 %v725_v11, %s1565_s25  ;;  %687 = vrot.lane.b32.xlu2 %v685_v12, %s1567_s27  ;;  %v602_v11 = vmul.f32 %v601_v4, %v1714_v58  ;;  %v469_v12 = vmul.f32 %v468_v5, %v1700_v41 }
  0xe0   :  { %707 = vrot.lane.b32.xlu1 %v705_v13, %s1566_s26  ;;  %v489_v13 = vmul.f32 %v488_v8, %v1700_v41 }
  0xe7   :  { %836 = vrot.lane.b32.xlu0 %v834_v18, %s1567_s27  ;;  %747 = vrot.lane.b32.xlu2 %v745_v19, %s1569_s4  ;;  %v1747_v19 = vld [vmem:[#allocation3] sm:$0x3f] }
  0xe8   :  { %767 = vrot.lane.b32.xlu1 %v765_v20, %s1570_s5  ;;  %v694_v20 = vstv %s1724_s22  ;;  %s1439_s22 = sld [smem:[#allocation8 + $0x13]] }
  0xe9   :  { %v695_v29 = vmul.f32 %v694_v20, %v1747_v19 }
  0xef   :  { %876 = vrot.lane.b32.xlu0 %v874_v24, %s1565_s25  ;;  %787 = vrot.lane.b32.xlu2 %v785_v25, %s1568_s3  ;;  %v581_v24 = vstv %s1729_s24  ;;  %v219_v25 = vmul.f32 %v218_v15, %v216_v16  ;;  %s1887_s24 = sld [smem:[#allocation8 + $0xd]] }
  0xf0   :  { %856 = vrot.lane.b32.xlu1 %v854_v26, %s1566_s26 }
  0xf7   :  { %989 = vrot.lane.b32.xlu0 %v987_v31, %s1567_s27  ;;  %896 = vrot.lane.b32.xlu2 %v894_v32, %s1569_s4  ;;  %v582_v32 = vmul.f32 %v581_v24, %v1714_v58 }
  0xf8   :  { %916 = vrot.lane.b32.xlu1 %v914_v33, %s1570_s5  ;;  %v522_v33 = vstv %s1737_s28  ;;  %s1891_s28 = sld [smem:[#allocation8 + $0x21]] }
  0xff   :  { %936 = vrot.lane.b32.xlu2 %v934_v38, %s1568_s3  ;;  %306 = vrot.lane.b32.xlu0 %v304_v39, %s1569_s4  ;;  %v523_v38 = vmul.f32 %v522_v33, %v1649_v55 }
 0x100   :  { %243 = vrot.lane.b32.xlu1 %v241_v40, %s1567_s27 }
 0x107   :  { %391 = vrot.lane.b32.xlu0 %v389_v46, %s1567_s27  ;;  %264 = vrot.lane.b32.xlu2 %v262_v47, %s1566_s26  ;;  %v621_v47 = vstv %s1751_s30  ;;  %s1910_s30 = sld [smem:[#allocation8 + $0x60]] }
 0x108   :  { %285 = vrot.lane.b32.xlu1 %v283_v48, %s1565_s25  ;;  %v622_v59 = vmul.f32 %v621_v47, %v1714_v58 }
 0x109   :  { %v1706_v49 = vpop.permute.xlu2 %253 }
 0x10a   :  { %v255_v22 = vrot.slane %v1706_v49, 2 }
 0x10c   :  { %v257_v34 = vsel %vm256_vm15, %v1706_v49, %v255_v22 }
 0x10f   :  { %451 = vrot.lane.b32.xlu0 %v449_v53, %s1569_s4  ;;  %327 = vrot.lane.b32.xlu2 %v325_v54, %s1570_s5 }
 0x110   :  { %348 = vrot.lane.b32.xlu1 %v346_v56, %s1568_s3  ;;  %v755_v56 = vmul.f32 %v754_v43, %v1747_v19 }
 0x111   :  { %v1712_v57 = vpop.permute.xlu2 %295 }
 0x112   :  { %v297_v35 = vrot.slane %v1712_v57, 2 }
 0x114   :  { %v299_v48 = vsel %vm298_vm2, %v1712_v57, %v297_v35 }
 0x117   :  { %544 = vrot.lane.b32.xlu0 %v542_v62, %s1567_s27  ;;  %411 = vrot.lane.b32.xlu2 %v409_v63, %s1566_s26 }
 0x118   :  { %431 = vrot.lane.b32.xlu1 %v429_v0, %s1565_s25 }
 0x119   :  { %v382_v2 = vpop.permute.xlu2 %381 }
 0x11a   :  { %v383_v3 = vrot.slane %v382_v2, 2 }
 0x11c   :  { %v384_v9 = vsel %vm234_vm14, %v382_v2, %v383_v3  ;;  %v794_v2 = vstv %s1771_s7  ;;  %v714_v3 = vstv %s1774_s8  ;;  %s1445_s7 = sld [smem:[#allocation8 + $0x28]] }
 0x11d   :  { %v1732_v10 = vadd.f32 %v384_v9, %v370_v6  ;;  %v734_v6 = vstv %s1779_s9  ;;  %s1933_s8 = sld [smem:[#allocation8 + $0x5]] }
 0x11e   :  { %v735_v15 = vmul.f32 %v734_v6, %v1747_v19  ;;  %v1871_v6 = vld [vmem:[#allocation3] sm:$0x3f]  ;;  %s1937_s9 = sld [smem:[#allocation8 + $0x1b]] }
 0x11f   :  { %604 = vrot.lane.b32.xlu0 %v602_v11, %s1569_s4  ;;  %471 = vrot.lane.b32.xlu2 %v469_v12, %s1570_s5  ;;  %v795_v11 = vmul.f32 %v794_v2, %v1747_v19  ;;  %v715_v12 = vmul.f32 %v714_v3, %v1747_v19  ;;  %v1026_v2 = vstv %s1845_s19  ;;  %v923_v3 = vstv %s1849_s0  ;;  %s1992_s19 = sld [smem:[#allocation8 + $0x22]] }
 0x120   :  { %491 = vrot.lane.b32.xlu1 %v489_v13, %s1568_s3  ;;  %s1456_s0 = sld [smem:[#allocation8 + $0x4c]] }
 0x121   :  { %v1742_v42 = vpop.permute.xlu2 %441  ;;  %v275_v17 = vpop.permute.xlu0 %274 }
 0x122   :  { %v232_v18 = vpop.permute.xlu1 %231  ;;  %v276_v28 = vrot.slane %v275_v17, 2  ;;  %v443_v8 = vrot.slane %v1742_v42, 2 }
 0x123   :  { %v233_v23 = vrot.slane %v232_v18, 2 }
 0x124   :  { %v278_v37 = vsel %vm277_vm1, %v275_v17, %v276_v28  ;;  %v444_v20 = vsel %vm298_vm2, %v1742_v42, %v443_v8  ;;  %v774_v28 = vstv %s1802_s12  ;;  %v996_v8 = vstv %s1438_s1  ;;  %s1955_s12 = sld [smem:[#allocation8 + $0x14]] }
 0x125   :  { %v235_v26 = vsel %vm234_vm14, %v232_v18, %v233_v23  ;;  %v675_v18 = vstv %s1794_s10  ;;  %s1941_s10 = sld [smem:[#allocation8 + $0x2f]] }
 0x126   :  { %v237_v31 = vadd.f32 %v235_v26, %v219_v25  ;;  %v1822_v25 = vld [vmem:[#allocation3] sm:$0x3f]  ;;  %v903_v26 = vstv %s1798_s11  ;;  %s1943_s11 = sld [smem:[#allocation8 + $0x3e]] }
 0x127   :  { %697 = vrot.lane.b32.xlu0 %v695_v29, %s1567_s27  ;;  %564 = vrot.lane.b32.xlu2 %v562_v30, %s1566_s26  ;;  %v676_v29 = vmul.f32 %v675_v18, %v1666_v7  ;;  %v904_v35 = vmul.f32 %v903_v26, %v1822_v25  ;;  %s2009_s1 = sld [smem:[#allocation8 + $0x5a]] }
 0x128   :  { %v259_v36 = vadd.f32 %v257_v34, %v237_v31  ;;  %584 = vrot.lane.b32.xlu1 %v582_v32, %s1565_s25  ;;  %v843_v32 = vstv %s1805_s13  ;;  %s1961_s13 = sld [smem:[#allocation8 + $0x53]] }
 0x129   :  { %v535_v39 = vpop.permute.xlu2 %534  ;;  %v338_v40 = vpop.permute.xlu0 %337 }
 0x12a   :  { %v280_v44 = vadd.f32 %v278_v37, %v259_v36  ;;  %v536_v45 = vrot.slane %v535_v39, 2  ;;  %v317_v46 = vpop.permute.xlu1 %316  ;;  %v339_v50 = vrot.slane %v338_v40, 2  ;;  %v775_v36 = vmul.f32 %v774_v28, %v1747_v19 }
 0x12b   :  { %v318_v49 = vrot.slane %v317_v46, 2 }
 0x12c   :  { %v537_v55 = vsel %vm234_vm14, %v535_v39, %v536_v45  ;;  %v301_v52 = vadd.f32 %v299_v48, %v280_v44  ;;  %v341_v61 = vsel %vm340_vm5, %v338_v40, %v339_v50  ;;  %v943_v45 = vstv %s1820_s14  ;;  %s1965_s14 = sld [smem:[#allocation8 + $0x45]] }
 0x12d   :  { %v1782_v53 = vadd.f32 %v537_v55, %v523_v38  ;;  %v320_v54 = vsel %vm319_vm3, %v317_v46, %v318_v49  ;;  %v844_v38 = vmul.f32 %v843_v32, %v1822_v25  ;;  %v863_v46 = vstv %s1826_s15  ;;  %s1366_s15 = sld [smem:[#allocation8 + $0x31]] }
 0x12e   :  { %v322_v57 = vadd.f32 %v320_v54, %v301_v52  ;;  %v883_v49 = vstv %s1428_s16  ;;  %v944_v55 = vmul.f32 %v943_v45, %v1822_v25  ;;  %v864_v52 = vmul.f32 %v863_v46, %v1822_v25  ;;  %s1988_s16 = sld [smem:[#allocation8 + $0x30]] }
 0x12f   :  { %757 = vrot.lane.b32.xlu0 %v755_v56, %s1569_s4  ;;  %624 = vrot.lane.b32.xlu2 %v622_v59, %s1570_s5  ;;  %v884_v56 = vmul.f32 %v883_v49, %v1822_v25  ;;  %v1139_v45 = vstv %s1887_s24  ;;  %v1046_v46 = vstv %s1891_s28  ;;  %s1574_s24 = smov 124   ;;  %s1449_s28 = sld [smem:[#allocation8 + $0x6]] }
 0x130   :  { %v1791_v62 = vadd.f32 %v341_v61, %v322_v57  ;;  %644 = vrot.lane.b32.xlu1 %v642_v60, %s1568_s3 }
 0x131   :  { %v1796_v63 = vpop.permute.xlu2 %594  ;;  %v422_v0 = vpop.permute.xlu0 %421 }
 0x132   :  { %v402_v1 = vpop.permute.xlu1 %401  ;;  %v423_v5 = vrot.slane %v422_v0, 2  ;;  %v596_v50 = vrot.slane %v1796_v63, 2 }
 0x133   :  { %v403_v4 = vrot.slane %v402_v1, 2 }
 0x134   :  { %v424_v16 = vsel %vm277_vm1, %v422_v0, %v423_v5  ;;  %v597_v60 = vsel %vm298_vm2, %v1796_v63, %v596_v50 }
 0x135   :  { %v404_v9 = vsel %vm256_vm15, %v402_v1, %v403_v4 }
 0x136   :  { %v406_v13 = vadd.f32 %v404_v9, %v1732_v10  ;;  %v1027_v9 = vmul.f32 %v1026_v2, %v1688_v27  ;;  %v1076_v2 = vstv %s1916_s6  ;;  %s1576_s6 = smov 122  }
 0x137   :  { %797 = vrot.lane.b32.xlu0 %v795_v11, %s1568_s3  ;;  %717 = vrot.lane.b32.xlu2 %v715_v12, %s1566_s26  ;;  %v924_v11 = vmul.f32 %v923_v3, %v1822_v25 }
 0x138   :  { %v426_v17 = vadd.f32 %v424_v16, %v406_v13  ;;  %737 = vrot.lane.b32.xlu1 %v735_v15, %s1565_s25  ;;  %v997_v13 = vmul.f32 %v996_v8, %v1871_v6 }
 0x139   :  { %v688_v21 = vpop.permute.xlu2 %687  ;;  %v482_v10 = vpop.permute.xlu0 %481 }
 0x13a   :  { %v689_v22 = vrot.slane %v688_v21, 2  ;;  %v462_v23 = vpop.permute.xlu1 %461  ;;  %v446_v24 = vadd.f32 %v444_v20, %v426_v17  ;;  %v483_v31 = vrot.slane %v482_v10, 2 }
 0x13b   :  { %v463_v30 = vrot.slane %v462_v23, 2 }
 0x13c   :  { %v690_v42 = vsel %vm234_vm14, %v688_v21, %v689_v22  ;;  %v484_v7 = vsel %vm340_vm5, %v482_v10, %v483_v31  ;;  %v1056_v21 = vstv %s1865_s20  ;;  %v1016_v10 = vstv %s1869_s21  ;;  %s1380_s20 = sld [smem:[#allocation8 + $0x32]]  ;;  %s1572_s21 = smov 126  }
 0x13d   :  { %v1831_v33 = vadd.f32 %v690_v42, %v676_v29  ;;  %v464_v34 = vsel %vm319_vm3, %v462_v23, %v463_v30  ;;  %v1057_v29 = vmul.f32 %v1056_v21, %v1871_v6  ;;  %v1017_v30 = vmul.f32 %v1016_v10, %v1871_v6 }
 0x13e   :  { %v466_v37 = vadd.f32 %v464_v34, %v446_v24  ;;  %v1006_v24 = vstv %s1439_s22  ;;  %s1573_s22 = smov 125  }
 0x13f   :  { %906 = vrot.lane.b32.xlu0 %v904_v35, %s1569_s4  ;;  %777 = vrot.lane.b32.xlu2 %v775_v36, %s1570_s5  ;;  %v1007_v32 = vmul.f32 %v1006_v24, %v1688_v27  ;;  %v824_v35 = vstv %s1883_s23  ;;  %s1436_s23 = sld [smem:[#allocation8 + $0x36]] }
 0x140   :  { %v1840_v39 = vadd.f32 %v484_v7, %v466_v37  ;;  %846 = vrot.lane.b32.xlu1 %v844_v38, %s1567_s27  ;;  %v825_v49 = vmul.f32 %v824_v35, %v1674_v14 }
 0x141   :  { %v1843_v40 = vpop.permute.xlu2 %747  ;;  %v575_v43 = vpop.permute.xlu0 %574 }
 0x142   :  { %v555_v44 = vpop.permute.xlu1 %554  ;;  %v576_v48 = vrot.slane %v575_v43, 2  ;;  %v749_v26 = vrot.slane %v1843_v40, 2 }
 0x143   :  { %v556_v47 = vrot.slane %v555_v44, 2 }
 0x144   :  { %v577_v59 = vsel %vm277_vm1, %v575_v43, %v576_v48  ;;  %v750_v36 = vsel %vm298_vm2, %v1843_v40, %v749_v26  ;;  %v1036_v40 = vstv %s1893_s29  ;;  %v1179_v26 = vstv %s1937_s9  ;;  %s1450_s29 = sld [smem:[#allocation8 + $0x37]] }
 0x145   :  { %v557_v51 = vsel %vm256_vm15, %v555_v44, %v556_v47  ;;  %v1912_v44 = vld [vmem:[#allocation2] sm:$0x3f] }
 0x146   :  { %v559_v54 = vadd.f32 %v557_v51, %v1782_v53 }
 0x147   :  { %946 = vrot.lane.b32.xlu0 %v944_v55, %s1568_s3  ;;  %866 = vrot.lane.b32.xlu2 %v864_v52, %s1566_s26  ;;  %v1140_v52 = vmul.f32 %v1139_v45, %v1912_v44 }
 0x148   :  { %v579_v57 = vadd.f32 %v577_v59, %v559_v54  ;;  %886 = vrot.lane.b32.xlu1 %v884_v56, %s1565_s25  ;;  %v1047_v54 = vmul.f32 %v1046_v46, %v1688_v27  ;;  %v1037_v59 = vmul.f32 %v1036_v40, %v1871_v6  ;;  %v223_v40 = vstv %s1366_s15 }
 0x149   :  { %v1863_v61 = vpop.permute.xlu2 %787  ;;  %v635_v0 = vpop.permute.xlu0 %634 }
 0x14a   :  { %v615_v53 = vpop.permute.xlu1 %614  ;;  %v599_v1 = vadd.f32 %v597_v60, %v579_v57  ;;  %v636_v5 = vrot.slane %v635_v0, 2  ;;  %v789_v47 = vrot.slane %v1863_v61, 2 }
 0x14b   :  { %v616_v4 = vrot.slane %v615_v53, 2 }
 0x14c   :  { %v637_v15 = vsel %vm340_vm5, %v635_v0, %v636_v5  ;;  %v790_v57 = vsel %vm340_vm5, %v1863_v61, %v789_v47 }
 0x14d   :  { %v617_v63 = vsel %vm319_vm3, %v615_v53, %v616_v4  ;;  %v1066_v4 = vstv %s1445_s7  ;;  %s2106_s7 = sld [smem:[#allocation8 + $0x62]] }
 0x14e   :  { %v619_v12 = vadd.f32 %v617_v63, %v599_v1  ;;  %v1096_v1 = vstv %s1910_s30  ;;  %s1575_s30 = smov 123  }
 0x14f   :  { %1029 = vrot.lane.b32.xlu0 %v1027_v9, %s1565_s25  ;;  %926 = vrot.lane.b32.xlu2 %v924_v11, %s1570_s5  ;;  %v1097_v63 = vmul.f32 %v1096_v1, %v1871_v6  ;;  %v1077_v9 = vmul.f32 %v1076_v2, %v1871_v6 }
 0x150   :  { %v1880_v16 = vadd.f32 %v637_v15, %v619_v12  ;;  %999 = vrot.lane.b32.xlu1 %v997_v13, %s1567_s27  ;;  %v1067_v12 = vmul.f32 %v1066_v4, %v1688_v27 }
 0x151   :  { %v1885_v17 = vpop.permute.xlu2 %896  ;;  %v728_v18 = vpop.permute.xlu0 %727 }
 0x152   :  { %v708_v20 = vpop.permute.xlu1 %707  ;;  %v729_v23 = vrot.slane %v728_v18, 2  ;;  %v898_v5 = vrot.slane %v1885_v17, 2 }
 0x153   :  { %v709_v22 = vrot.slane %v708_v20, 2 }
 0x154   :  { %v730_v42 = vsel %vm277_vm1, %v728_v18, %v729_v23  ;;  %v977_v18 = vstv %s1933_s8  ;;  %s1577_s8 = smov [#allocation9]  }
 0x155   :  { %v710_v28 = vsel %vm256_vm15, %v708_v20, %v709_v22  ;;  %v899_v20 = vsel %vm298_vm2, %v1885_v17, %v898_v5  ;;  %v1149_v17 = vstv %s1943_s11  ;;  %s1350_s9 = sshll.u32 %s1577_s8, 4  ;;  %s1351_s9 = int_to_ptr.vmem [resolvable:$true] %s1350_s9 }
 0x156   :  { %v712_v31 = vadd.f32 %v710_v28, %v1831_v33  ;;  %v1086_v28 = vstv %s1941_s10 }
 0x157   :  { %1059 = vrot.lane.b32.xlu0 %v1057_v29, %s1569_s4  ;;  %1019 = vrot.lane.b32.xlu2 %v1017_v30, %s1566_s26 }
 0x158   :  { %v732_v34 = vadd.f32 %v730_v42, %v712_v31  ;;  %1009 = vrot.lane.b32.xlu1 %v1007_v32, %s1566_s26  ;;  %v978_v31 = vmul.f32 %v977_v18, %v1688_v27  ;;  %v1969_v32 = vld [vmem:[#allocation3] sm:$0x3f] }
 0x159   :  { %v1908_v37 = vpop.permute.xlu2 %936  ;;  %v837_v33 = vpop.permute.xlu0 %836 }
 0x15a   :  { %v768_v38 = vpop.permute.xlu1 %767  ;;  %v752_v7 = vadd.f32 %v750_v36, %v732_v34  ;;  %v838_v43 = vrot.slane %v837_v33, 2  ;;  %v938_v29 = vrot.slane %v1908_v37, 2  ;;  %v1180_v36 = vmul.f32 %v1179_v26, %v1912_v44 }
 0x15b   :  { %v769_v48 = vrot.slane %v768_v38, 2 }
 0x15c   :  { %v839_v50 = vsel %vm234_vm14, %v837_v33, %v838_v43  ;;  %v1087_v33 = vmul.f32 %v1086_v28, %v1688_v27  ;;  %v939_v43 = vsel %vm340_vm5, %v1908_v37, %v938_v29  ;;  %v221_v37 = vld [vmem:[#allocation3] sm:$0xf]  ;;  %v1229_v28 = vstv %s2009_s1 }
 0x15d   :  { %v770_v51 = vsel %vm319_vm3, %v768_v38, %v769_v48  ;;  %v841_v55 = vadd.f32 %v839_v50, %v825_v49  ;;  %v1209_v48 = vstv %s1961_s13  ;;  %v1169_v49 = vstv %s1965_s14 }
 0x15e   :  { %v772_v56 = vadd.f32 %v770_v51, %v752_v7  ;;  %v1150_v7 = vmul.f32 %v1149_v17, %v1969_v32  ;;  %v1159_v51 = vstv %s1955_s12  ;;  %s1352_s12 = sshll.u32 %s2123_s2, 4  ;;  %s1353_s12 = int_to_ptr.hbm [resolvable:$true] %s1352_s12 }
 0x15f   :  { %1142 = vrot.lane.b32.xlu0 %v1140_v52, %s1567_s27  ;;  %1049 = vrot.lane.b32.xlu2 %v1047_v54, %s1569_s4  ;;  %v1210_v52 = vmul.f32 %v1209_v48, %v1969_v32  ;;  %v1170_v54 = vmul.f32 %v1169_v49, %v1969_v32 }
 0x160   :  { %v1930_v14 = vadd.f32 %v790_v57, %v772_v56  ;;  %1039 = vrot.lane.b32.xlu1 %v1037_v59, %s1565_s25  ;;  %v224_v56 = vmul.f32 %v223_v40, %v221_v37  ;;  %v1160_v59 = vmul.f32 %v1159_v51, %v1912_v44 }
 0x161   :  { %v1935_v60 = vpop.permute.xlu2 %264  ;;  %v877_v0 = vpop.permute.xlu0 %876 }
 0x162   :  { %v857_v53 = vpop.permute.xlu1 %856  ;;  %v878_v3 = vrot.slane %v877_v0, 2  ;;  %v266_v57 = vrot.slane %v1935_v60, 2 }
 0x163   :  { %v858_v61 = vrot.slane %v857_v53, 2 }
 0x164   :  { %v879_v13 = vsel %vm277_vm1, %v877_v0, %v878_v3  ;;  %v1199_v3 = vstv %s1992_s19  ;;  %v267_v4 = vsel %vm256_vm15, %v1935_v60, %v266_v57 }
 0x165   :  { %v859_v8 = vsel %vm256_vm15, %v857_v53, %v858_v61  ;;  %v1239_v61 = vstv %s1988_s16 }
 0x166   :  { %v861_v11 = vadd.f32 %v859_v8, %v841_v55 }
 0x167   :  { %1099 = vrot.lane.b32.xlu0 %v1097_v63, %s1568_s3  ;;  %1079 = vrot.lane.b32.xlu2 %v1077_v9, %s1570_s5  ;;  %v1189_v63 = vstv %s1456_s0 }
 0x168   :  { %v881_v15 = vadd.f32 %v879_v13, %v861_v11  ;;  %1069 = vrot.lane.b32.xlu1 %v1067_v12, %s1570_s5  ;;  %v1240_v12 = vmul.f32 %v1239_v61, %v1912_v44  ;;  %v1200_v13 = vmul.f32 %v1199_v3, %v1912_v44  ;;  %v1190_v18 = vmul.f32 %v1189_v63, %v1969_v32 }
 0x169   :  { %v1959_v21 = vpop.permute.xlu2 %327  ;;  %v990_v10 = vpop.permute.xlu0 %989 }
 0x16a   :  { %v917_v22 = vpop.permute.xlu1 %916  ;;  %v901_v23 = vadd.f32 %v899_v20, %v881_v15  ;;  %v991_v24 = vrot.slane %v990_v10, 2  ;;  %v329_v20 = vrot.slane %v1959_v21, 2 }
 0x16b   :  { %v918_v30 = vrot.slane %v917_v22, 2 }
 0x16c   :  { %v992_v42 = vsel %vm234_vm14, %v990_v10, %v991_v24  ;;  %v330_v29 = vsel %vm319_vm3, %v1959_v21, %v329_v20 }
 0x16d   :  { %v919_v34 = vsel %vm319_vm3, %v917_v22, %v918_v30  ;;  %v1974_v35 = vadd.f32 %v992_v42, %v978_v31  ;;  %v374_v30 = vstv %s1380_s20 }
 0x16e   :  { %v921_v38 = vadd.f32 %v919_v34, %v901_v23 }
 0x16f   :  { %1182 = vrot.lane.b32.xlu0 %v1180_v36, %s1565_s25  ;;  %1089 = vrot.lane.b32.xlu2 %v1087_v33, %s1568_s3  ;;  %v1230_v33 = vmul.f32 %v1229_v28, %v1969_v32 }
 0x170   :  { %v1983_v45 = vadd.f32 %v939_v43, %v921_v38  ;;  %1152 = vrot.lane.b32.xlu1 %v1150_v7, %s1567_s27  ;;  %s2005_s27 = sld [smem:[#allocation8 + $0x29]]  ;;  %v375_v38 = vmul.f32 %v374_v30, %v1700_v41 }
 0x171   :  { %v1986_v46 = vpop.permute.xlu2 %411  ;;  %v307_v47 = vpop.permute.xlu0 %306 }
 0x172   :  { %v244_v27 = vpop.permute.xlu1 %243  ;;  %v308_v5 = vrot.slane %v307_v47, 2 }
 0x173   :  { %v245_v50 = vrot.slane %v244_v27, 2 }
 0x174   :  { %v309_v60 = vsel %vm298_vm2, %v307_v47, %v308_v5  ;;  %v413_v47 = vrot.slane %v1986_v46, 2 }
 0x175   :  { %v246_v55 = vsel %vm234_vm14, %v244_v27, %v245_v50 }
 0x176   :  { %v248_v0 = vadd.f32 %v246_v55, %v224_v56  ;;  %v1219_v17 = vstv %s2005_s27  ;;  %v414_v37 = vsel %vm256_vm15, %v1986_v46, %v413_v47 }
 0x177   :  { %1212 = vrot.lane.b32.xlu0 %v1210_v52, %s1569_s4  ;;  %1172 = vrot.lane.b32.xlu2 %v1170_v54, %s1566_s26  ;;  %v1220_v43 = vmul.f32 %v1219_v17, %v1912_v44 }
 0x178   :  { %1162 = vrot.lane.b32.xlu1 %v1160_v59, %s1566_s26  ;;  %v269_v9 = vadd.f32 %v267_v4, %v248_v0  ;;  %s1462_s26 = sld [smem:[#allocation8 + $0x61]] }
 0x179   :  { %v2003_v53 = vpop.permute.xlu2 %471  ;;  %v392_v1 = vpop.permute.xlu0 %391 }
 0x17a   :  { %v286_v2 = vpop.permute.xlu1 %285  ;;  %v393_v22 = vrot.slane %v392_v1, 2 }
 0x17b   :  { %v287_v8 = vrot.slane %v286_v2, 2 }
 0x17c   :  { %v394_v34 = vsel %vm234_vm14, %v392_v1, %v393_v22 }
 0x17d   :  { %v288_v11 = vsel %vm277_vm1, %v286_v2, %v287_v8  ;;  %v396_v21 = vadd.f32 %v394_v34, %v375_v38 }
 0x17e   :  { %v290_v15 = vadd.f32 %v288_v11, %v269_v9  ;;  %v1249_v51 = vstv %s1462_s26 }
 0x17f   :  { %1242 = vrot.lane.b32.xlu0 %v1240_v12, %s1568_s3  ;;  %1202 = vrot.lane.b32.xlu2 %v1200_v13, %s1569_s4  ;;  %v416_v55 = vadd.f32 %v414_v37, %v396_v21  ;;  %v1250_v56 = vmul.f32 %v1249_v51, %v1969_v32  ;;  %s1571_s4 = smov 127  }
 0x180   :  { %v311_v10 = vadd.f32 %v309_v60, %v290_v15  ;;  %1192 = vrot.lane.b32.xlu1 %v1190_v18, %s1565_s25  ;;  %s1394_s25 = sld [smem:[#allocation8 + $0x33]] }
 0x181   :  { %v565_v23 = vpop.permute.xlu2 %564  ;;  %v452_v24 = vpop.permute.xlu0 %451 }
 0x182   :  { %v349_v26 = vpop.permute.xlu1 %348  ;;  %v332_v42 = vadd.f32 %v330_v29, %v311_v10  ;;  %v453_v41 = vrot.slane %v452_v24, 2  ;;  %v566_v12 = vrot.slane %v565_v23, 2 }
 0x183   :  { %v350_v31 = vrot.slane %v349_v26, 2 }
 0x184   :  { %v454_v59 = vsel %vm298_vm2, %v452_v24, %v453_v41  ;;  %v567_v10 = vsel %vm256_vm15, %v565_v23, %v566_v12 }
 0x185   :  { %v351_v36 = vsel %vm340_vm5, %v349_v26, %v350_v31 }
 0x186   :  { %v353_v7 = vadd.f32 %v351_v36, %v332_v42  ;;  %v527_v3 = vstv %s1394_s25 }
 0x187   :  { %1232 = vrot.lane.b32.xlu2 %v1230_v33, %s1570_s5  ;;  %v528_v9 = vmul.f32 %v527_v3, %v1714_v58 }
 0x188   :  { %v354_v27 = vadd.f32 %v353_v7, %v1791_v62  ;;  %1222 = vrot.lane.b32.xlu1 %v1220_v43, %s1570_s5  ;;  %v473_v62 = vrot.slane %v2003_v53, 2  ;;  %s1422_s5 = sld [smem:[#allocation8 + $0x35]] }
 0x189   :  { %v625_v48 = vpop.permute.xlu2 %624  ;;  %v545_v49 = vpop.permute.xlu0 %544 }
 0x18a   :  { %358 = vst [vmem:[#allocation1] ss:$4 sm:$0xff] %v354_v27  ;;  %v432_v40 = vpop.permute.xlu1 %431  ;;  %v546_v0 = vrot.slane %v545_v49, 2  ;;  %v474_v61 = vsel %vm319_vm3, %v2003_v53, %v473_v62  ;;  %v626_v30 = vrot.slane %v625_v48, 2 }
 0x18b   :  { %v433_v50 = vrot.slane %v432_v40, 2 }
 0x18c   :  { %v547_v8 = vsel %vm234_vm14, %v545_v49, %v546_v0  ;;  %v627_v38 = vsel %vm319_vm3, %v625_v48, %v626_v30 }
 0x18d   :  { %v434_v52 = vsel %vm277_vm1, %v432_v40, %v433_v50  ;;  %v549_v13 = vadd.f32 %v547_v8, %v528_v9 }
 0x18e   :  { %v436_v54 = vadd.f32 %v434_v52, %v416_v55 }
 0x18f   :  { %v569_v28 = vadd.f32 %v567_v10, %v549_v13 }
 0x190   :  { %v456_v57 = vadd.f32 %v454_v59, %v436_v54  ;;  %1252 = vrot.lane.b32.xlu1 %v1250_v56, %s1568_s3  ;;  %s1408_s3 = sld [smem:[#allocation8 + $0x34]] }
 0x191   :  { %v605_v1 = vpop.permute.xlu0 %604  ;;  %v718_v46 = vpop.permute.xlu2 %717  ;;  %v2048_v20 = vld.sshfl [vmem:[#allocation1] sm:$0xff pattern:$0x73625140]  ;;  %v2050_v60 = vld.sshfl [vmem:[#allocation1 + $0x8] sm:$0xff pattern:$0x73625140] }
 0x192   :  { %v492_v2 = vpop.permute.xlu1 %491  ;;  %v476_v5 = vadd.f32 %v474_v61, %v456_v57  ;;  %v606_v22 = vrot.slane %v605_v1, 2  ;;  %v719_v41 = vrot.slane %v718_v46, 2 }
 0x193   :  { %v493_v4 = vrot.slane %v492_v2, 2 }
 0x194   :  { %v720_v48 = vsel %vm256_vm15, %v718_v46, %v719_v41 }
 0x195   :  { %v494_v63 = vsel %vm340_vm5, %v492_v2, %v493_v4 }
 0x196   :  { %v496_v11 = vadd.f32 %v494_v63, %v476_v5  ;;  %v680_v7 = vstv %s1408_s3 }
 0x197   :  { %v681_v49 = vmul.f32 %v680_v7, %v1747_v19 }
 0x198   :  { %v497_v15 = vadd.f32 %v496_v11, %v1840_v39  ;;  %v607_v39 = vsel %vm298_vm2, %v605_v1, %v606_v22  ;;  %v829_v11 = vstv %s1422_s5 }
 0x199   :  { %v698_v18 = vpop.permute.xlu0 %697  ;;  %v778_v26 = vpop.permute.xlu2 %777 }
 0x19a   :  { %v585_v53 = vpop.permute.xlu1 %584  ;;  %501 = vst [vmem:[#allocation1] ss:$4 sm:$0xff] %v497_v15  ;;  %v699_v17 = vrot.slane %v698_v18, 2  ;;  %v779_v59 = vrot.slane %v778_v26, 2 }
 0x19b   :  { %v586_v24 = vrot.slane %v585_v53, 2 }
 0x19c   :  { %v700_v21 = vsel %vm234_vm14, %v698_v18, %v699_v17 }
 0x19d   :  { %v587_v58 = vsel %vm277_vm1, %v585_v53, %v586_v24  ;;  %v702_v50 = vadd.f32 %v700_v21, %v681_v49  ;;  %v830_v53 = vmul.f32 %v829_v11, %v1822_v25 }
 0x19e   :  { %v589_v29 = vadd.f32 %v587_v58, %v569_v28 }
 0x19f   :  { %v722_v62 = vadd.f32 %v720_v48, %v702_v50 }
 0x1a0   :  { %v609_v31 = vadd.f32 %v607_v39, %v589_v29 }
 0x1a1   :  { %v504_v42 = vld.sshfl [vmem:[#allocation1 + $0x10] sm:$0xff pattern:$0x73625140]  ;;  %v503_v34 = vld.sshfl [vmem:[#allocation1 + $0x8] sm:$0xff pattern:$0x73625140]  ;;  %v758_v36 = vpop.permute.xlu0 %757  ;;  %v867_v40 = vpop.permute.xlu2 %866 }
 0x1a2   :  { %v645_v33 = vpop.permute.xlu1 %644  ;;  %509 = vrot.lane.b32.xlu1 %v504_v42, %s1571_s4  ;;  %507 = vrot.lane.b32.xlu0 %v503_v34, %s1571_s4  ;;  %v502_v23 = vld.sshfl [vmem:[#allocation1] sm:$0xff pattern:$0x73625140]  ;;  %v629_v47 = vadd.f32 %v627_v38, %v609_v31  ;;  %v759_v54 = vrot.slane %v758_v36, 2  ;;  %v868_v10 = vrot.slane %v867_v40, 2 }
 0x1a3   :  { %v646_v43 = vrot.slane %v645_v33, 2  ;;  %505 = vrot.lane.b32.xlu2 %v502_v23, %s1571_s4 }
 0x1a4   :  { %v760_v19 = vsel %vm298_vm2, %v758_v36, %v759_v54  ;;  %v869_v58 = vsel %vm256_vm15, %v867_v40, %v868_v10 }
 0x1a5   :  { %v647_v27 = vsel %vm340_vm5, %v645_v33, %v646_v43 }
 0x1a6   :  { %v649_v37 = vadd.f32 %v647_v27, %v629_v47 }
 0x1a8   :  { %v650_v51 = vadd.f32 %v649_v37, %v1880_v16  ;;  %v780_v16 = vsel %vm319_vm3, %v778_v26, %v779_v59 }
 0x1a9   :  { %v798_v55 = vpop.permute.xlu0 %797  ;;  %v927_v2 = vpop.permute.xlu2 %926 }
 0x1aa   :  { %654 = vst [vmem:[#allocation1] ss:$4 sm:$0xff] %v650_v51  ;;  %v738_v52 = vpop.permute.xlu1 %737  ;;  %v799_v1 = vrot.slane %v798_v55, 2  ;;  %v928_v31 = vrot.slane %v927_v2, 2  ;;  %v982_v51 = vstv %s1436_s23 }
 0x1ab   :  { %v739_v56 = vrot.slane %v738_v52, 2 }
 0x1ac   :  { %v800_v9 = vsel %vm340_vm5, %v798_v55, %v799_v1  ;;  %v929_v23 = vsel %vm319_vm3, %v927_v2, %v928_v31 }
 0x1ad   :  { %v740_v57 = vsel %vm277_vm1, %v738_v52, %v739_v56  ;;  %v983_v56 = vmul.f32 %v982_v51, %v1871_v6 }
 0x1ae   :  { %v742_v0 = vadd.f32 %v740_v57, %v722_v62 }
 0x1b0   :  { %v762_v61 = vadd.f32 %v760_v19, %v742_v0 }
 0x1b1   :  { %v657_v3 = vld.sshfl [vmem:[#allocation1 + $0x10] sm:$0xff pattern:$0x73625140]  ;;  %v656_v4 = vld.sshfl [vmem:[#allocation1 + $0x8] sm:$0xff pattern:$0x73625140]  ;;  %v907_v5 = vpop.permute.xlu0 %906  ;;  %v1020_v26 = vpop.permute.xlu2 %1019 }
 0x1b2   :  { %v782_v8 = vadd.f32 %v780_v16, %v762_v61  ;;  %v847_v46 = vpop.permute.xlu1 %846  ;;  %662 = vrot.lane.b32.xlu1 %v657_v3, %s1572_s21  ;;  %660 = vrot.lane.b32.xlu0 %v656_v4, %s1572_s21  ;;  %v655_v63 = vld.sshfl [vmem:[#allocation1] sm:$0xff pattern:$0x73625140]  ;;  %v908_v29 = vrot.slane %v907_v5, 2  ;;  %v1021_v48 = vrot.slane %v1020_v26, 2 }
 0x1b3   :  { %v848_v12 = vrot.slane %v847_v46, 2  ;;  %658 = vrot.lane.b32.xlu2 %v655_v63, %s1572_s21 }
 0x1b4   :  { %v802_v13 = vadd.f32 %v800_v9, %v782_v8  ;;  %v1022_v1 = vsel %vm256_vm15, %v1020_v26, %v1021_v48 }
 0x1b5   :  { %v849_v15 = vsel %vm234_vm14, %v847_v46, %v848_v12 }
 0x1b6   :  { %v803_v18 = vadd.f32 %v802_v13, %v1930_v14  ;;  %v851_v22 = vadd.f32 %v849_v15, %v830_v53  ;;  %v909_v14 = vsel %vm298_vm2, %v907_v5, %v908_v29 }
 0x1b8   :  { %805 = vst [vmem:[#allocation1] ss:$4 sm:$0xff] %v803_v18  ;;  %v871_v39 = vadd.f32 %v869_v58, %v851_v22 }
 0x1b9   :  { %v947_v24 = vpop.permute.xlu0 %946  ;;  %v1050_v21 = vpop.permute.xlu2 %1049 }
 0x1ba   :  { %v887_v28 = vpop.permute.xlu1 %886  ;;  %v948_v34 = vrot.slane %v947_v24, 2  ;;  %v1051_v8 = vrot.slane %v1050_v21, 2 }
 0x1bb   :  { %v888_v30 = vrot.slane %v887_v28, 2 }
 0x1bc   :  { %v949_v47 = vsel %vm340_vm5, %v947_v24, %v948_v34 }
 0x1bd   :  { %v889_v17 = vsel %vm277_vm1, %v887_v28, %v888_v30 }
 0x1be   :  { %v891_v42 = vadd.f32 %v889_v17, %v871_v39 }
 0x1bf   :  { %v808_v36 = vld.sshfl [vmem:[#allocation1 + $0x10] sm:$0xff pattern:$0x73625140]  ;;  %v807_v25 = vld.sshfl [vmem:[#allocation1 + $0x8] sm:$0xff pattern:$0x73625140] }
 0x1c0   :  { %v911_v33 = vadd.f32 %v909_v14, %v891_v42  ;;  %813 = vrot.lane.b32.xlu0 %v808_v36, %s1573_s22  ;;  %811 = vrot.lane.b32.xlu2 %v807_v25, %s1573_s22  ;;  %v806_v40 = vld.sshfl [vmem:[#allocation1] sm:$0xff pattern:$0x73625140] }
 0x1c1   :  { %v1030_v38 = vpop.permute.xlu0 %1029  ;;  %v1080_v54 = vpop.permute.xlu2 %1079 }
 0x1c2   :  { %v931_v7 = vadd.f32 %v929_v23, %v911_v33  ;;  %v1000_v43 = vpop.permute.xlu1 %999  ;;  %v1031_v2 = vrot.slane %v1030_v38, 2  ;;  %v1081_v12 = vrot.slane %v1080_v54, 2 }
 0x1c3   :  { %v1001_v37 = vrot.slane %v1000_v43, 2 }
 0x1c4   :  { %v951_v27 = vadd.f32 %v949_v47, %v931_v7  ;;  %v1032_v46 = vsel %vm277_vm1, %v1030_v38, %v1031_v2  ;;  %v1082_v28 = vsel %vm319_vm3, %v1080_v54, %v1081_v12 }
 0x1c5   :  { %v1002_v55 = vsel %vm234_vm14, %v1000_v43, %v1001_v37 }
 0x1c6   :  { %v952_v49 = vadd.f32 %v951_v27, %v1983_v45  ;;  %v1004_v57 = vadd.f32 %v1002_v55, %v983_v56  ;;  %v1135_v27 = vstv %s1450_s29 }
 0x1c7   :  { %v1136_v55 = vmul.f32 %v1135_v27, %v1969_v32 }
 0x1c8   :  { %809 = vrot.lane.b32.xlu0 %v806_v40, %s1573_s22  ;;  %956 = vst [vmem:[#allocation1] ss:$4 sm:$0xff] %v952_v49  ;;  %v1024_v3 = vadd.f32 %v1022_v1, %v1004_v57 }
 0x1c9   :  { %v1060_v41 = vpop.permute.xlu0 %1059  ;;  %v1090_v9 = vpop.permute.xlu2 %1089 }
 0x1ca   :  { %v1010_v50 = vpop.permute.xlu1 %1009  ;;  %v1061_v4 = vrot.slane %v1060_v41, 2  ;;  %v1091_v22 = vrot.slane %v1090_v9, 2 }
 0x1cb   :  { %v1011_v52 = vrot.slane %v1010_v50, 2 }
 0x1cc   :  { %v1062_v13 = vsel %vm298_vm2, %v1060_v41, %v1061_v4  ;;  %v1092_v31 = vsel %vm340_vm5, %v1090_v9, %v1091_v22 }
 0x1cd   :  { %v1012_v45 = vsel %vm256_vm15, %v1010_v50, %v1011_v52 }
 0x1ce   :  { %v1014_v16 = vadd.f32 %v1012_v45, %v1974_v35  ;;  %v1052_v35 = vsel %vm298_vm2, %v1050_v21, %v1051_v8  ;;  %v1130_v21 = vstv %s1449_s28 }
 0x1cf   :  { %v959_v62 = vld.sshfl [vmem:[#allocation1 + $0x10] sm:$0xff pattern:$0x73625140]  ;;  %v958_v59 = vld.sshfl [vmem:[#allocation1 + $0x8] sm:$0xff pattern:$0x73625140]  ;;  %v1131_v51 = vmul.f32 %v1130_v21, %v1912_v44 }
 0x1d0   :  { %964 = vrot.lane.b32.xlu2 %v959_v62, %s1574_s24  ;;  %962 = vrot.lane.b32.xlu1 %v958_v59, %s1574_s24  ;;  %v957_v63 = vld.sshfl [vmem:[#allocation1] sm:$0xff pattern:$0x73625140]  ;;  %v1034_v11 = vadd.f32 %v1032_v46, %v1014_v16 }
 0x1d1   :  { %v1143_v0 = vpop.permute.xlu0 %1142  ;;  %v1173_v36 = vpop.permute.xlu2 %1172 }
 0x1d2   :  { %v1040_v19 = vpop.permute.xlu1 %1039  ;;  %v1054_v26 = vadd.f32 %v1052_v35, %v1034_v11  ;;  %v1144_v43 = vrot.slane %v1143_v0, 2  ;;  %v1174_v48 = vrot.slane %v1173_v36, 2 }
 0x1d3   :  { %v1041_v61 = vrot.slane %v1040_v19, 2 }
 0x1d4   :  { %v1145_v41 = vsel %vm234_vm14, %v1143_v0, %v1144_v43 }
 0x1d5   :  { %v1042_v6 = vsel %vm277_vm1, %v1040_v19, %v1041_v61  ;;  %v1147_v62 = vadd.f32 %v1145_v41, %v1131_v51  ;;  %v1175_v19 = vsel %vm256_vm15, %v1173_v36, %v1174_v48 }
 0x1d6   :  { %v1044_v5 = vadd.f32 %v1042_v6, %v1024_v3 }
 0x1d8   :  { %960 = vrot.lane.b32.xlu1 %v957_v63, %s1574_s24  ;;  %v1064_v18 = vadd.f32 %v1062_v13, %v1044_v5 }
 0x1d9   :  { %v1100_v15 = vpop.permute.xlu0 %1099  ;;  %v1203_v40 = vpop.permute.xlu2 %1202 }
 0x1da   :  { %v1070_v53 = vpop.permute.xlu1 %1069  ;;  %v1101_v10 = vrot.slane %v1100_v15, 2  ;;  %v1084_v39 = vadd.f32 %v1082_v28, %v1064_v18  ;;  %v1204_v61 = vrot.slane %v1203_v40, 2 }
 0x1db   :  { %v1071_v24 = vrot.slane %v1070_v53, 2 }
 0x1dc   :  { %v1102_v29 = vsel %vm340_vm5, %v1100_v15, %v1101_v10  ;;  %v1205_v8 = vsel %vm298_vm2, %v1203_v40, %v1204_v61 }
 0x1dd   :  { %v1072_v58 = vsel %vm319_vm3, %v1070_v53, %v1071_v24  ;;  %v1104_v42 = vadd.f32 %v1102_v29, %v1084_v39 }
 0x1de   :  { %v1074_v30 = vadd.f32 %v1072_v58, %v1054_v26 }
 0x1e0   :  { %v1094_v17 = vadd.f32 %v1092_v31, %v1074_v30 }
 0x1e1   :  { %v1183_v25 = vpop.permute.xlu0 %1182  ;;  %v1233_v3 = vpop.permute.xlu2 %1232 }
 0x1e2   :  { %v1105_v34 = vadd.f32 %v1104_v42, %v1094_v17  ;;  %v1153_v14 = vpop.permute.xlu1 %1152  ;;  %v1184_v57 = vrot.slane %v1183_v25, 2  ;;  %v1234_v46 = vrot.slane %v1233_v3, 2 }
 0x1e3   :  { %v1154_v47 = vrot.slane %v1153_v14, 2 }
 0x1e4   :  { %1109 = vst [vmem:[#allocation1] ss:$4 sm:$0xff] %v1105_v34  ;;  %v1185_v44 = vsel %vm277_vm1, %v1183_v25, %v1184_v57  ;;  %v1235_v53 = vsel %vm319_vm3, %v1233_v3, %v1234_v46  ;;  %v189_v25 = vlaneseq }
 0x1e5   :  { %v1155_v50 = vsel %vm234_vm14, %v1153_v14, %v1154_v47  ;;  %vm966_vm14 = vcmask 1014784  }
 0x1e6   :  { %v1157_v59 = vadd.f32 %v1155_v50, %v1136_v55 }
 0x1e8   :  { %v1177_v0 = vadd.f32 %v1175_v19, %v1157_v59 }
 0x1e9   :  { %v1213_v52 = vpop.permute.xlu0 %1212 }
 0x1ea   :  { %v1163_v33 = vpop.permute.xlu1 %1162  ;;  %v1214_v16 = vrot.slane %v1213_v52, 2 }
 0x1eb   :  { %v1112_v23 = vld.sshfl [vmem:[#allocation1 + $0x10] sm:$0xff pattern:$0x73625140]  ;;  %v1111_v38 = vld.sshfl [vmem:[#allocation1 + $0x8] sm:$0xff pattern:$0x73625140] }
 0x1ec   :  { %1117 = vrot.lane.b32.xlu0 %v1112_v23, %s1575_s30  ;;  %v1110_v7 = vld.sshfl [vmem:[#allocation1] sm:$0xff pattern:$0x73625140]  ;;  %1115 = vrot.lane.b32.xlu2 %v1111_v38, %s1575_s30  ;;  %v1164_v49 = vrot.slane %v1163_v33, 2  ;;  %v1215_v63 = vsel %vm298_vm2, %v1213_v52, %v1214_v16 }
 0x1ed   :  { %1113 = vrot.lane.b32.xlu1 %v1110_v7, %s1575_s30  ;;  %v190_v7 = vand.u32 127, %v189_v25 }
 0x1ee   :  { %v1165_v54 = vsel %vm256_vm15, %v1163_v33, %v1164_v49  ;;  %vm815_vm15 = vcmask 1022976  }
 0x1ef   :  { %v1167_v45 = vadd.f32 %v1165_v54, %v1147_v62  ;;  %v191_v43 = vadd.s32 128, %v190_v7  ;;  %v196_v27 = vand.u32 15, %v190_v7 }
 0x1f1   :  { %v1187_v4 = vadd.f32 %v1185_v44, %v1167_v45  ;;  %v1243_v5 = vpop.permute.xlu0 %1242  ;;  %v203_v49 = vand.u32 15, %v191_v43  ;;  %vm498_vm9 = vcmp.ge.s32.totalorder %v196_v27, 2  ;;  %vm355_vm10 = vcmp.ge.s32.totalorder %v196_v27, 3 }
 0x1f2   :  { %v1193_v37 = vpop.permute.xlu1 %1192  ;;  %v1244_v13 = vrot.slane %v1243_v5, 2  ;;  %vm651_vm13 = vcmp.ge.s32.totalorder %v196_v27, 1  ;;  %v363_v48 = vsel %vm355_vm10, %v2048_v20, 0.0 }
 0x1f3   :  { %v1194_v56 = vrot.slane %v1193_v37, 2  ;;  %v1207_v12 = vadd.f32 %v1205_v8, %v1187_v4  ;;  %vm499_vm8 = vcmp.ge.s32.totalorder %v203_v49, 2  ;;  %vm356_vm11 = vcmp.ge.s32.totalorder %v203_v49, 3 }
 0x1f4   :  { %v1245_v22 = vsel %vm340_vm5, %v1243_v5, %v1244_v13  ;;  %vm652_vm12 = vcmp.ge.s32.totalorder %v203_v49, 1  ;;  %v364_v54 = vsel %vm356_vm11, %v2050_v60, 0.0  ;;  %vm954_vm2 = vcmp.lt.s32.totalorder %v203_v49, 15 }
 0x1f5   :  { %v1195_v1 = vsel %vm277_vm1, %v1193_v37, %v1194_v56  ;;  %vm1119_vm1 = vcmask 1006592  }
 0x1f6   :  { %v1197_v6 = vadd.f32 %v1195_v1, %v1177_v0 }
 0x1f8   :  { %v1217_v11 = vadd.f32 %v1215_v63, %v1197_v6 }
 0x1fa   :  { %v1223_v2 = vpop.permute.xlu1 %1222  ;;  %v1237_v35 = vadd.f32 %v1235_v53, %v1217_v11 }
 0x1fb   :  { %v1224_v32 = vrot.slane %v1223_v2, 2 }
 0x1fd   :  { %v1225_v9 = vsel %vm319_vm3, %v1223_v2, %v1224_v32  ;;  %v506_v42 = vpop.permute.xlu2 %505  ;;  %vm953_vm3 = vcmp.lt.s32.totalorder %v196_v27, 15 }
 0x1fe   :  { %v1227_v15 = vadd.f32 %v1225_v9, %v1207_v12 }
 0x200   :  { %v1247_v26 = vadd.f32 %v1245_v22, %v1227_v15 }
 0x202   :  { %v1253_v18 = vpop.permute.xlu1 %1252 }
 0x203   :  { %v1254_v10 = vrot.slane %v1253_v18, 2 }
 0x205   :  { %v1255_v24 = vsel %vm340_vm5, %v1253_v18, %v1254_v10  ;;  %vm1107_vm5 = vcmp.lt.s32.totalorder %v203_v49, 14  ;;  %v1282_v10 = vstv %s2106_s7 }
 0x206   :  { %v1257_v28 = vadd.f32 %v1255_v24, %v1237_v35 }
 0x208   :  { %v1258_v58 = vadd.f32 %v1257_v28, %v1247_v26 }
 0x20a   :  { %1262 = vst [vmem:[#allocation1] ss:$4 sm:$0xff] %v1258_v58 }
 0x20d   :  { %v659_v36 = vpop.permute.xlu2 %658 }
 0x211   :  { %v1265_v29 = vld.sshfl [vmem:[#allocation1 + $0x10] sm:$0xff pattern:$0x73625140]  ;;  %v1264_v30 = vld.sshfl [vmem:[#allocation1 + $0x8] sm:$0xff pattern:$0x73625140] }
 0x212   :  { %1270 = vrot.lane.b32.xlu0 %v1265_v29, %s1576_s6  ;;  %1268 = vrot.lane.b32.xlu2 %v1264_v30, %s1576_s6  ;;  %v1263_v39 = vld.sshfl [vmem:[#allocation1] sm:$0xff pattern:$0x73625140] }
 0x213   :  { %1266 = vrot.lane.b32.xlu1 %v1263_v39, %s1576_s6 }
 0x214   :  { %v508_v31 = vpop.permute.xlu0 %507  ;;  %v510_v17 = vpop.permute.xlu1 %509 }
 0x215   :  { %v513_v37 = vsel %vm511_vm6, %v508_v31, %v510_v17  ;;  %v512_v41 = vsel %vm511_vm6, %v506_v42, %v508_v31  ;;  %vm1106_vm6 = vcmp.lt.s32.totalorder %v196_v27, 14 }
 0x216   :  { %v517_v51 = vsel %vm499_vm8, %v513_v37, 0.0  ;;  %v516_v52 = vsel %vm498_vm9, %v512_v41, 0.0  ;;  %vm1260_vm8 = vcmp.lt.s32.totalorder %v203_v49, 13  ;;  %vm1259_vm9 = vcmp.lt.s32.totalorder %v196_v27, 13 }
 0x217   :  { %v519_v57 = vadd.f32 %v517_v51, %v364_v54  ;;  %v518_v0 = vadd.f32 %v516_v52, %v363_v48 }
 0x21a   :  { %v812_v38 = vpop.permute.xlu2 %811 }
 0x224   :  { %v661_v34 = vpop.permute.xlu0 %660  ;;  %v663_v14 = vpop.permute.xlu1 %662 }
 0x225   :  { %v666_v50 = vsel %vm664_vm7, %v661_v34, %v663_v14  ;;  %v665_v55 = vsel %vm664_vm7, %v659_v36, %v661_v34  ;;  %vm1272_vm7 = vcmask 998400  }
 0x226   :  { %v670_v56 = vsel %vm652_vm12, %v666_v50, 0.0  ;;  %v669_v45 = vsel %vm651_vm13, %v665_v55, 0.0 }
 0x227   :  { %v672_v20 = vadd.f32 %v670_v56, %v519_v57  ;;  %v671_v16 = vadd.f32 %v669_v45, %v518_v0  ;;  %v1323_v45 = vld [vmem:[#allocation4] sm:$0xff] }
 0x22a   :  { %v965_v47 = vpop.permute.xlu2 %964 }
 0x232   :  { %v814_v33 = vpop.permute.xlu0 %813 }
 0x233   :  { %v817_v2 = vsel %vm815_vm15, %v812_v38, %v814_v33 }
 0x234   :  { %v821_v4 = vadd.f32 %v817_v2, %v672_v20  ;;  %v1324_v2 = vld [vmem:[#allocation4 + $0x8] sm:$0xff] }
 0x23a   :  { %v810_v21 = vpop.permute.xlu0 %809 }
 0x23b   :  { %v816_v60 = vsel %vm815_vm15, %v810_v21, %v812_v38 }
 0x23c   :  { %v820_v5 = vadd.f32 %v816_v60, %v671_v16 }
 0x242   :  { %v963_v23 = vpop.permute.xlu1 %962 }
 0x243   :  { %v968_v19 = vsel %vm966_vm14, %v963_v23, %v965_v47 }
 0x244   :  { %v972_v32 = vsel %vm954_vm2, %v968_v19, 0.0  ;;  %vm1328_vm2 = vcmask 1040384  }
 0x245   :  { %v974_v46 = vadd.f32 %v972_v32, %v821_v4 }
 0x246   :  { %v1116_v62 = vpop.permute.xlu2 %1115 }
 0x24a   :  { %v961_v40 = vpop.permute.xlu1 %960 }
 0x24b   :  { %v967_v61 = vsel %vm966_vm14, %v961_v40, %v963_v23 }
 0x24c   :  { %v971_v6 = vsel %vm953_vm3, %v967_v61, 0.0 }
 0x24d   :  { %v973_v9 = vadd.f32 %v971_v6, %v820_v5 }
 0x25e   :  { %v1118_v59 = vpop.permute.xlu0 %1117 }
 0x25f   :  { %v1114_v1 = vpop.permute.xlu1 %1113  ;;  %v1121_v44 = vsel %vm1119_vm1, %v1116_v62, %v1118_v59 }
 0x260   :  { %v1120_v3 = vsel %vm1119_vm1, %v1114_v1, %v1116_v62  ;;  %v1125_v8 = vsel %vm1107_vm5, %v1121_v44, 0.0 }
 0x261   :  { %v1124_v63 = vsel %vm1106_vm6, %v1120_v3, 0.0  ;;  %v1127_v13 = vadd.f32 %v1125_v8, %v974_v46 }
 0x262   :  { %v1126_v53 = vadd.f32 %v1124_v63, %v973_v9 }
 0x26c   :  { %v1269_v11 = vpop.permute.xlu2 %1268 }
 0x284   :  { %v1271_v12 = vpop.permute.xlu0 %1270 }
 0x285   :  { %v1267_v15 = vpop.permute.xlu1 %1266  ;;  %v1274_v18 = vsel %vm1272_vm7, %v1269_v11, %v1271_v12 }
 0x286   :  { %v1273_v35 = vsel %vm1272_vm7, %v1267_v15, %v1269_v11  ;;  %v1278_v22 = vsel %vm1260_vm8, %v1274_v18, 0.0 }
 0x287   :  { %v1277_v24 = vsel %vm1259_vm9, %v1273_v35, 0.0  ;;  %v1280_v26 = vadd.f32 %v1278_v22, %v1127_v13 }
 0x288   :  { %v1279_v28 = vadd.f32 %v1277_v24, %v1126_v53 }
 0x289   :  { %v1284_v58 = vadd.f32 %v1282_v10, %v1280_v26 }
 0x28a   :  { %v1283_v29 = vadd.f32 %v1282_v10, %v1279_v28 }
 0x28b   :  { %v1465_v30 = vmul.f32 -1.442695, %v1284_v58 }
 0x28c   :  { %v1464_v39 = vmul.f32 -1.442695, %v1283_v29 }
 0x28d   :  { %1485 = vpow2.f32 %v1465_v30 }
 0x28e   :  { %1487 = vpow2.f32 %v1464_v39 }
 0x293   :  { %v1486_v31 = vpop.eup %1485 }
 0x294   :  { %v1488_v17 = vpop.eup %1487  ;;  %v1292_v42 = vadd.f32 1.0, %v1486_v31 }
 0x295   :  { %v1291_v34 = vadd.f32 1.0, %v1488_v17 }
 0x296   :  { %1489 = vrcp.f32 %v1292_v42  ;;  %v1319_v7 = vand.u32 2147483648, %v1292_v42  ;;  %v1317_v47 = vand.u32 2147483647, %v1292_v42  ;;  %vm1313_vm12 = vweird.f32 %v1292_v42 }
 0x297   :  { %1491 = vrcp.f32 %v1291_v34  ;;  %v1304_v27 = vand.u32 2147483648, %v1291_v34  ;;  %v1302_v49 = vand.u32 2147483647, %v1291_v34  ;;  %vm1298_vm13 = vweird.f32 %v1291_v34 }
 0x298   :  { %v1320_v41 = vor.u32 1.1754944e-38, %v1319_v7  ;;  %vm1318_vm1 = vcmp.eq.f32.partialorder %v1317_v47, 8.507059e+37 }
 0x299   :  { %v1305_v55 = vor.u32 1.1754944e-38, %v1304_v27  ;;  %vm1303_vm3 = vcmp.eq.f32.partialorder %v1302_v49, 8.507059e+37 }
 0x29c   :  { %v1490_v14 = vpop.eup %1489 }
 0x29d   :  { %v1492_v36 = vpop.eup %1491  ;;  %v1309_v25 = vmul.f32 %v1490_v14, %v1292_v42  ;;  %vm1314_vm10 = vweird.f32 %v1490_v14 }
 0x29e   :  { %v1294_v33 = vmul.f32 %v1492_v36, %v1291_v34  ;;  %vm1299_vm11 = vweird.f32 %v1492_v36  ;;  %vm1315_vm14 = vmor %vm1313_vm12, %vm1314_vm10 }
 0x29f   :  { %v1310_v23 = vsub.f32 1.0, %v1309_v25  ;;  %vm1300_vm15 = vmor %vm1298_vm13, %vm1299_vm11 }
 0x2a0   :  { %v1295_v38 = vsub.f32 1.0, %v1294_v33 }
 0x2a1   :  { %v1311_v43 = vmul.f32 %v1490_v14, %v1310_v23 }
 0x2a2   :  { %v1296_v21 = vmul.f32 %v1492_v36, %v1295_v38 }
 0x2a3   :  { %v1312_v40 = vadd.f32 %v1490_v14, %v1311_v43 }
 0x2a4   :  { %v1297_v37 = vadd.f32 %v1492_v36, %v1296_v21 }
 0x2a5   :  { %v1316_v50 = vsel %vm1315_vm14, %v1490_v14, %v1312_v40 }
 0x2a6   :  { %v1301_v51 = vsel %vm1300_vm15, %v1492_v36, %v1297_v37  ;;  %v1321_v52 = vsel %vm1318_vm1, %v1320_v41, %v1316_v50 }
 0x2a7   :  { %v1327_v48 = vrot.slane %v1321_v52, 7  ;;  %v1306_v54 = vsel %vm1303_vm3, %v1305_v55, %v1301_v51 }
 0x2a9   :  { %v1329_v56 = vsel %vm1328_vm2, %v1306_v54, %v1327_v48  ;;  %v1330_v62 = vsel %vm148_vm4, %v1306_v54, %v1327_v48 }
 0x2aa   :  { %v1331_v59 = vrot.slane %v1330_v62, 1  ;;  %v1333_v57 = vperm.slane %v1329_v56, 1  ;;  %v1332_v19 = vperm.slane %v1329_v56, 0 }
 0x2ac   :  { %v1335_v1 = vperm.slane %v1331_v59, 1  ;;  %v1336_v0 = vrot.slane %v1333_v57, 4  ;;  %v1334_v61 = vperm.slane %v1331_v59, 0 }
 0x2ae   :  { %v1337_v20 = vrot.slane %v1335_v1, 4  ;;  %v1338_v60 = vsel %vm56_vm0, %v1332_v19, %v1336_v0 }
 0x2af   :  { %v1342_v44 = vmul.f32 %v1338_v60, %v1323_v45 }
 0x2b0   :  { %v1339_v16 = vsel %vm56_vm0, %v1334_v61, %v1337_v20 }
 0x2b1   :  { %v1343_v32 = vmul.f32 %v1339_v16, %v1324_v2  ;;  %1344 = vst [vmem:[#allocation9] sm:$0xff] %v1342_v44 }
 0x2b3   :  { %1345 = vst [vmem:[#allocation9 + $0x8] sm:$0xff] %v1343_v32 }
 0x2b4   :  { %1358 = dma.vmem_to_hbm [thread:$0]  %s1351_s9, 256, %s1353_s12, [#allocation6], %s1560_s17, %s1560_s17, %s1561_s18  }
 0x2b5   :  { %1557 = dma.done.wait [#allocation6], 256  }
 0x2b6   :  { %1558 = vsyncadd [#allocation6], 4294967040 }
 0x2b7   :  { %1363 = vsyncpa [#allocation5], 1 }
 0x2b8   :  { %1364 = vsyncpa [#allocation6], 1 }
 0x2b9   :  { %1365 = vsyncpa [#allocation7], 1 }

</bundles_post_ra>
